<compile_context>
chip_gen: v7x
topology: tpu7x:2x2x1
jax: 0.10.0
libtpu: 0.0.40
codegen_flags: <defaults>
</compile_context>

<pallas_src>
import math
from dataclasses import dataclass

import jax
import jax.numpy as jnp
from jax.experimental import pallas as pl
from jax.experimental.pallas import tpu as pltpu


@dataclass
class InfNeRFConfig:
    max_depth: int = 8
    base_resolution: int = 8       # reduced from 32 to keep hash tables tiny
    hidden_dim: int = 64
    geo_feat_dim: int = 15
    num_layers: int = 2
    num_layers_color: int = 3
    num_levels: int = 8            # reduced from 16 (small synthetic config)
    level_dim: int = 2
    per_level_scale: float = 2.0
    log2_hashmap_size: int = 12    # reduced from 19


# ----------------------------------------------------------------------------
# parameter initialization (deterministic, synthetic)
# ----------------------------------------------------------------------------
def _xavier_uniform(key, fan_in, fan_out):
    limit = math.sqrt(6.0 / (fan_in + fan_out))
    return jax.random.uniform(key, (fan_in, fan_out), jnp.float32, -limit, limit)


def init_params(config: InfNeRFConfig, level: int, key):
    complexity = min(1.0, (level + 1) / config.max_depth)
    hidden = max(32, int(config.hidden_dim * complexity))
    num_geo_layers = max(1, int(config.num_layers * complexity))
    assert num_geo_layers == 1, "kernel below is specialized for a 1-layer geo net"

    keys = jax.random.split(key, 32)
    ki = iter(range(32))

    # hash-encoder embedding tables
    tables = []
    for i in range(config.num_levels):
        res = int(config.base_resolution * config.per_level_scale ** i)
        n_emb = min(res ** 3, 2 ** config.log2_hashmap_size)
        tables.append(jax.random.uniform(
            keys[next(ki)], (n_emb, config.level_dim), jnp.float32, -1e-4, 1e-4))

    feat_dim = config.num_levels * config.level_dim           # 16
    sh_dim = 9                                                # actual SH width
    cin_dim = config.geo_feat_dim + sh_dim                    # 24

    params = {
        "tables": tables,
        "w_geo": _xavier_uniform(keys[next(ki)], feat_dim, hidden),
        "b_geo": jnp.zeros((1, hidden), jnp.float32),
        "w_dh": _xavier_uniform(keys[next(ki)], hidden, 1 + config.geo_feat_dim),
        "b_dh": jnp.zeros((1, 1 + config.geo_feat_dim), jnp.float32),
        "w_c0": _xavier_uniform(keys[next(ki)], cin_dim, config.hidden_dim),
        "b_c0": jnp.zeros((1, config.hidden_dim), jnp.float32),
        "w_c1": _xavier_uniform(keys[next(ki)], config.hidden_dim, config.hidden_dim),
        "b_c1": jnp.zeros((1, config.hidden_dim), jnp.float32),
        "w_c2": _xavier_uniform(keys[next(ki)], config.hidden_dim, config.hidden_dim),
        "b_c2": jnp.zeros((1, config.hidden_dim), jnp.float32),
        "w_ch": _xavier_uniform(keys[next(ki)], config.hidden_dim, 3),
        "b_ch": jnp.zeros((1, 3), jnp.float32),
    }
    return params


# ----------------------------------------------------------------------------
# hash encoding (plain-JAX glue: data-dependent gather from embedding tables)
# ----------------------------------------------------------------------------
def hash_encode(positions, tables, config: InfNeRFConfig):
    feats = []
    for i, table in enumerate(tables):
        res = int(config.base_resolution * config.per_level_scale ** i)
        scaled = (positions + 1.0) / 2.0 * (res - 1)
        scaled = jnp.clip(scaled, 0.0, float(res - 1))
        idx_f = scaled[..., 0] * (res ** 2) + scaled[..., 1] * res + scaled[..., 2]
        idx = jnp.clip(idx_f, 0.0, float(table.shape[0] - 1)).astype(jnp.int32)
        feats.append(jnp.take(table, idx, axis=0))
    return jnp.concatenate(feats, axis=-1)


# ----------------------------------------------------------------------------
# spherical-harmonics dir encoding (degree-4 encoder, 9 features) — wrapper side
# ----------------------------------------------------------------------------
def sh_encode(directions):
    x = directions[:, 0:1]
    y = directions[:, 1:2]
    z = directions[:, 2:3]
    return jnp.concatenate(
        [jnp.full_like(x, 0.5), x, y, z,
         x * y, x * z, y * z, x * x - y * y, 3.0 * z * z - 1.0],
        axis=-1)


# ----------------------------------------------------------------------------
# Pallas forward: geo MLP + fused density head + color MLP + heads
# (channel-major layout, bf16 MXU, consolidated weight slabs)
# ----------------------------------------------------------------------------
def lod_nerf_forward(positions, directions, params, config: InfNeRFConfig, tn: int = 512):
    N = positions.shape[0]
    feat_dim = config.num_levels * config.level_dim      # 16
    sh_dim = 9
    gdim = config.geo_feat_dim                           # 15
    hidden = params["w_geo"].shape[1]                    # 32 for this level
    CH = config.hidden_dim                               # 64
    CIN = 32                                             # fused input width (16 + 9 + pad)
    assert hidden == CIN, "slab packing assumes geo hidden width == fused input width"

    # ---- encodings (XLA side) and fused channel-major bf16 input ----
    feat = hash_encode(positions, params["tables"], config)     # [N, 16]
    sh = sh_encode(directions)                                  # [N, 9]
    x_t = jnp.concatenate(
        [feat.T, sh.T, jnp.zeros((CIN - feat_dim - sh_dim, N), jnp.float32)],
        axis=0).astype(jnp.bfloat16)                            # [32, N]

    TN = tn
    assert TN % 128 == 0, "tile width must be a lane multiple"
    Npad = ((N + TN - 1) // TN) * TN
    if Npad != N:
        x_t = jnp.pad(x_t, ((0, 0), (0, Npad - N)))
    grid_n = Npad // TN

    # ---- weight prep: transposed, algebraically fused, packed into slabs ----
    w_c0 = params["w_c0"]
    w_c0_geo, w_c0_sh = w_c0[:gdim, :], w_c0[gdim:, :]

    # slab A (everything multiplying a 32-wide activation):
    #   rows [0, hidden)          : geo layer   (from fused input x)
    #   rows [hidden, hidden+CH)  : SH -> color0 contribution (from x)
    #   rows [hidden+CH, +CH)     : fused density-head -> color0 (from geo hidden h)
    #   rows [.., +8)             : sigma head (row 0 real, rest zero pad) (from h)
    WgT = jnp.zeros((hidden, CIN), jnp.float32).at[:, :feat_dim].set(params["w_geo"].T)
    WshT = jnp.zeros((CH, CIN), jnp.float32).at[:, feat_dim:feat_dim + sh_dim].set(w_c0_sh.T)
    WfT = (params["w_dh"][:, 1:] @ w_c0_geo).T                                  # [CH, hidden]
    WsigT = jnp.zeros((8, hidden), jnp.float32).at[0, :].set(params["w_dh"][:, 0])
    wa = jnp.concatenate([WgT, WshT, WfT, WsigT], axis=0).astype(jnp.bfloat16)  # [168, 32]

    # slab B (everything multiplying a 64-wide activation):
    WchT_pad = jnp.zeros((8, CH), jnp.float32).at[:3, :].set(params["w_ch"].T)
    wb = jnp.concatenate([params["w_c1"].T, params["w_c2"].T, WchT_pad],
                         axis=0).astype(jnp.bfloat16)                           # [136, 64]

    # bias slab (f32 column vectors, 8-row aligned segments)
    bf = (params["b_dh"][:, 1:] @ w_c0_geo + params["b_c0"]).T                  # [CH, 1]
    bsig = jnp.zeros((8, 1), jnp.float32).at[0, 0].set(params["b_dh"][0, 0])
    bch = jnp.zeros((8, 1), jnp.float32).at[:3, :].set(params["b_ch"].T)
    b_slab = jnp.concatenate(
        [params["b_geo"].T, bf, bsig, params["b_c1"].T, params["b_c2"].T, bch],
        axis=0)                                                                 # [240, 1]

    X_ROWS = hidden + CH              # 96: slab-A rows applied to x
    A_ROWS = X_ROWS + CH + 8          # 168
    OFF_BG = 0
    OFF_BF = hidden                   # 32
    OFF_BS = hidden + CH              # 96
    OFF_B1 = OFF_BS + 8               # 104
    OFF_B2 = OFF_B1 + CH              # 168
    OFF_BCH = OFF_B2 + CH             # 232

    def kernel(x_ref, wa_ref, wb_ref, b_ref, out_ref):
        x = x_ref[...]                                               # [CIN, TN] bf16

        # stage 1: geo layer + SH->color0 contribution (one stacked matmul from x)
        ax = jnp.dot(wa_ref[0:X_ROWS, :], x,
                     preferred_element_type=jnp.float32)             # [96, TN] f32
        h = jnp.maximum(ax[0:hidden, :] + b_ref[OFF_BG:OFF_BG + hidden, :], 0.0)
        sh_c0 = ax[hidden:X_ROWS, :]                                 # [CH, TN]

        # stage 2: fused density-head->color0 + sigma head (one stacked matmul from h)
        ah = jnp.dot(wa_ref[X_ROWS:A_ROWS, :], h.astype(jnp.bfloat16),
                     preferred_element_type=jnp.float32)             # [72, TN]
        c0 = jnp.maximum(ah[0:CH, :] + sh_c0 + b_ref[OFF_BF:OFF_BF + CH, :], 0.0)
        sigma = ah[CH:CH + 1, :] + b_ref[OFF_BS:OFF_BS + 1, :]        # [1, TN]

        # color MLP hidden layers + rgb head (padded to 8 output rows)
        c1 = jnp.maximum(
            jnp.dot(wb_ref[0:CH, :], c0.astype(jnp.bfloat16),
                    preferred_element_type=jnp.float32)
            + b_ref[OFF_B1:OFF_B1 + CH, :], 0.0)
        c2 = jnp.maximum(
            jnp.dot(wb_ref[CH:2 * CH, :], c1.astype(jnp.bfloat16),
                    preferred_element_type=jnp.float32)
            + b_ref[OFF_B2:OFF_B2 + CH, :], 0.0)
        rgb8 = jnp.dot(wb_ref[2 * CH:2 * CH + 8, :], c2.astype(jnp.bfloat16),
                       preferred_element_type=jnp.float32)            # [8, TN]
        rgb = rgb8[0:3, :] + b_ref[OFF_BCH:OFF_BCH + 3, :]            # [3, TN]

        # density = softplus(sigma - 1) (stable form); color = sigmoid(rgb)
        s = sigma - 1.0
        density = jnp.maximum(s, 0.0) + jnp.log1p(jnp.exp(-jnp.abs(s)))
        color = pl.reciprocal(1.0 + jnp.exp(-rgb), approx=True)

        # lane-dense packed output [density | rgb] -> one full-width store per tile
        out_ref[...] = jnp.concatenate([density, color], axis=0)     # [4, TN]

    # advisory cost estimate
    flops_per_pt = 2 * (CIN * X_ROWS + hidden * (CH + 8) + 2 * CH * CH + CH * 8)
    cost = pl.CostEstimate(
        flops=flops_per_pt * Npad,
        transcendentals=5 * Npad,
        bytes_accessed=(Npad * (CIN * 2 + 4 * 4)
                        + (wa.size + wb.size) * 2 + b_slab.size * 4))

    packed = pl.pallas_call(
        kernel,
        out_shape=jax.ShapeDtypeStruct((4, Npad), jnp.float32),
        grid=(grid_n,),
        in_specs=[pl.BlockSpec((CIN, TN), lambda i: (0, i)),
                  pl.BlockSpec(wa.shape, lambda i: (0, 0)),
                  pl.BlockSpec(wb.shape, lambda i: (0, 0)),
                  pl.BlockSpec(b_slab.shape, lambda i: (0, 0))],
        out_specs=pl.BlockSpec((4, TN), lambda i: (0, i)),
        compiler_params=pltpu.CompilerParams(dimension_semantics=("parallel",)),
        cost_estimate=cost,
    )(x_t, wa, wb, b_slab)

    return {"density": packed[0:1, :N].T, "color": packed[1:4, :N].T}


# ----------------------------------------------------------------------------
# plain-JAX reference (mirrors the PyTorch forward) for a sanity check
# ----------------------------------------------------------------------------
def ref_forward(positions, directions, params, config: InfNeRFConfig):
    feat = hash_encode(positions, params["tables"], config)
    h = jax.nn.relu(feat @ params["w_geo"] + params["b_geo"])
    geo_out = h @ params["w_dh"] + params["b_dh"]
    density_raw = geo_out[:, :1]
    geo_feat = geo_out[:, 1:]
    x, y, z = directions[:, 0], directions[:, 1], directions[:, 2]
    sh = jnp.stack([0.5 * jnp.ones_like(x), x, y, z,
                    x * y, x * z, y * z, x * x - y * y, 3 * z * z - 1], axis=-1)
    cin = jnp.concatenate([geo_feat, sh], axis=-1)
    c = jax.nn.relu(cin @ params["w_c0"] + params["b_c0"])
    c = jax.nn.relu(c @ params["w_c1"] + params["b_c1"])
    c = jax.nn.relu(c @ params["w_c2"] + params["b_c2"])
    rgb = c @ params["w_ch"] + params["b_ch"]
    return {"density": jax.nn.softplus(density_raw - 1.0),
            "color": jax.nn.sigmoid(rgb)}


if __name__ == "__main__":
    config = InfNeRFConfig()
    level = 3                      # complexity 0.5 -> hidden=32, 1 geo layer
    key = jax.random.PRNGKey(0)
    k_param, k_pos, k_dir = jax.random.split(key, 3)

    params = init_params(config, level, k_param)

    N = 4096                       # 8 parallel tiles of 512 -> >=4 pipelined steps per v7x TC
    positions = jax.random.uniform(k_pos, (N, 3), jnp.float32, -1.0, 1.0)
    directions = jax.random.normal(k_dir, (N, 3), jnp.float32)
    directions = directions / jnp.linalg.norm(directions, axis=-1, keepdims=True)

    out = lod_nerf_forward(positions, directions, params, config, tn=512)
    jax.block_until_ready(out)

    ref = ref_forward(positions, directions, params, config)
    assert out["density"].shape == (N, 1) and out["color"].shape == (N, 3)
    assert jnp.allclose(out["density"], ref["density"], rtol=2e-2, atol=2e-2)
    assert jnp.allclose(out["color"], ref["color"], rtol=2e-2, atol=2e-2)

    print("KERNEL_OK")
</pallas_src>

<mosaic_0001>
module attributes {stable_mosaic.version = 11 : i64} {
  func.func @kernel(%arg0: i32, %arg1: memref<32x512xbf16, #tpu.memory_space<vmem>>, %arg2: memref<168x32xbf16, #tpu.memory_space<vmem>>, %arg3: memref<136x64xbf16, #tpu.memory_space<vmem>>, %arg4: memref<240x1xf32, #tpu.memory_space<vmem>>, %arg5: memref<4x512xf32, #tpu.memory_space<vmem>>) attributes {dimension_semantics = [#tpu.dimension_semantics<parallel>], iteration_bounds = array<i64: 8>, scalar_prefetch = 0 : i64, scratch_operands = 0 : i64, tpu.core_type = #tpu.core_type<tc>, window_params = [{transform_indices = @transform_0, window_bounds = array<i64: 32, 512>}, {pipeline_mode = #tpu.pipeline_mode<synchronous>, transform_indices = @transform_1, window_bounds = array<i64: 168, 32>}, {pipeline_mode = #tpu.pipeline_mode<synchronous>, transform_indices = @transform_2, window_bounds = array<i64: 136, 64>}, {pipeline_mode = #tpu.pipeline_mode<synchronous>, transform_indices = @transform_3, window_bounds = array<i64: 240, 1>}, {transform_indices = @transform_4, window_bounds = array<i64: 4, 512>}]} {
    %c0 = arith.constant 0 : index
    %c0_0 = arith.constant 0 : index
    %0 = vector.load %arg1[%c0, %c0_0] : memref<32x512xbf16, #tpu.memory_space<vmem>>, vector<32x512xbf16>
    %c0_1 = arith.constant 0 : index
    %c0_2 = arith.constant 0 : index
    %1 = vector.load %arg2[%c0_1, %c0_2] : memref<168x32xbf16, #tpu.memory_space<vmem>>, vector<96x32xbf16>
    %cst = arith.constant dense<0.000000e+00> : vector<96x512xf32>
    %2 = tpu.matmul %1, %0, %cst {dimension_numbers = #tpu.dot_dimension_numbers<[1], [0], [0], [1], [0, 0, 1, 1], [], []>} : vector<96x32xbf16>, vector<32x512xbf16>, vector<96x512xf32> -> vector<96x512xf32>
    %3 = vector.extract_strided_slice %2 {offsets = [0, 0], sizes = [32, 512], strides = [1, 1]} : vector<96x512xf32> to vector<32x512xf32>
    %c0_3 = arith.constant 0 : index
    %c0_4 = arith.constant 0 : index
    %4 = vector.load %arg4[%c0_3, %c0_4] : memref<240x1xf32, #tpu.memory_space<vmem>>, vector<32x1xf32>
    %5 = vector.broadcast %4 : vector<32x1xf32> to vector<32x512xf32>
    %6 = arith.addf %3, %5 : vector<32x512xf32>
    %cst_5 = arith.constant 0.000000e+00 : f32
    %7 = vector.broadcast %cst_5 : f32 to vector<32x512xf32>
    %8 = arith.maximumf %6, %7 : vector<32x512xf32>
    %9 = vector.extract_strided_slice %2 {offsets = [32, 0], sizes = [64, 512], strides = [1, 1]} : vector<96x512xf32> to vector<64x512xf32>
    %c96 = arith.constant 96 : index
    %c0_6 = arith.constant 0 : index
    %10 = vector.load %arg2[%c96, %c0_6] : memref<168x32xbf16, #tpu.memory_space<vmem>>, vector<72x32xbf16>
    %11 = arith.truncf %8 : vector<32x512xf32> to vector<32x512xbf16>
    %cst_7 = arith.constant dense<0.000000e+00> : vector<72x512xf32>
    %12 = tpu.matmul %10, %11, %cst_7 {dimension_numbers = #tpu.dot_dimension_numbers<[1], [0], [0], [1], [0, 0, 1, 1], [], []>} : vector<72x32xbf16>, vector<32x512xbf16>, vector<72x512xf32> -> vector<72x512xf32>
    %13 = vector.extract_strided_slice %12 {offsets = [0, 0], sizes = [64, 512], strides = [1, 1]} : vector<72x512xf32> to vector<64x512xf32>
    %14 = arith.addf %13, %9 : vector<64x512xf32>
    %c32 = arith.constant 32 : index
    %c0_8 = arith.constant 0 : index
    %15 = vector.load %arg4[%c32, %c0_8] : memref<240x1xf32, #tpu.memory_space<vmem>>, vector<64x1xf32>
    %16 = vector.broadcast %15 : vector<64x1xf32> to vector<64x512xf32>
    %17 = arith.addf %14, %16 : vector<64x512xf32>
    %cst_9 = arith.constant 0.000000e+00 : f32
    %18 = vector.broadcast %cst_9 : f32 to vector<64x512xf32>
    %19 = arith.maximumf %17, %18 : vector<64x512xf32>
    %20 = vector.extract_strided_slice %12 {offsets = [64, 0], sizes = [1, 512], strides = [1, 1]} : vector<72x512xf32> to vector<1x512xf32>
    %c96_10 = arith.constant 96 : index
    %c0_11 = arith.constant 0 : index
    %21 = vector.load %arg4[%c96_10, %c0_11] : memref<240x1xf32, #tpu.memory_space<vmem>>, vector<1x1xf32>
    %22 = vector.broadcast %21 : vector<1x1xf32> to vector<1x512xf32>
    %23 = arith.addf %20, %22 : vector<1x512xf32>
    %c0_12 = arith.constant 0 : index
    %c0_13 = arith.constant 0 : index
    %24 = vector.load %arg3[%c0_12, %c0_13] : memref<136x64xbf16, #tpu.memory_space<vmem>>, vector<64x64xbf16>
    %25 = arith.truncf %19 : vector<64x512xf32> to vector<64x512xbf16>
    %cst_14 = arith.constant dense<0.000000e+00> : vector<64x512xf32>
    %26 = tpu.matmul %24, %25, %cst_14 {dimension_numbers = #tpu.dot_dimension_numbers<[1], [0], [0], [1], [0, 0, 1, 1], [], []>} : vector<64x64xbf16>, vector<64x512xbf16>, vector<64x512xf32> -> vector<64x512xf32>
    %c104 = arith.constant 104 : index
    %c0_15 = arith.constant 0 : index
    %27 = vector.load %arg4[%c104, %c0_15] : memref<240x1xf32, #tpu.memory_space<vmem>>, vector<64x1xf32>
    %28 = vector.broadcast %27 : vector<64x1xf32> to vector<64x512xf32>
    %29 = arith.addf %26, %28 : vector<64x512xf32>
    %cst_16 = arith.constant 0.000000e+00 : f32
    %30 = vector.broadcast %cst_16 : f32 to vector<64x512xf32>
    %31 = arith.maximumf %29, %30 : vector<64x512xf32>
    %c64 = arith.constant 64 : index
    %c0_17 = arith.constant 0 : index
    %32 = vector.load %arg3[%c64, %c0_17] : memref<136x64xbf16, #tpu.memory_space<vmem>>, vector<64x64xbf16>
    %33 = arith.truncf %31 : vector<64x512xf32> to vector<64x512xbf16>
    %cst_18 = arith.constant dense<0.000000e+00> : vector<64x512xf32>
    %34 = tpu.matmul %32, %33, %cst_18 {dimension_numbers = #tpu.dot_dimension_numbers<[1], [0], [0], [1], [0, 0, 1, 1], [], []>} : vector<64x64xbf16>, vector<64x512xbf16>, vector<64x512xf32> -> vector<64x512xf32>
    %c168 = arith.constant 168 : index
    %c0_19 = arith.constant 0 : index
    %35 = vector.load %arg4[%c168, %c0_19] : memref<240x1xf32, #tpu.memory_space<vmem>>, vector<64x1xf32>
    %36 = vector.broadcast %35 : vector<64x1xf32> to vector<64x512xf32>
    %37 = arith.addf %34, %36 : vector<64x512xf32>
    %cst_20 = arith.constant 0.000000e+00 : f32
    %38 = vector.broadcast %cst_20 : f32 to vector<64x512xf32>
    %39 = arith.maximumf %37, %38 : vector<64x512xf32>
    %c128 = arith.constant 128 : index
    %c0_21 = arith.constant 0 : index
    %40 = vector.load %arg3[%c128, %c0_21] : memref<136x64xbf16, #tpu.memory_space<vmem>>, vector<8x64xbf16>
    %41 = arith.truncf %39 : vector<64x512xf32> to vector<64x512xbf16>
    %cst_22 = arith.constant dense<0.000000e+00> : vector<8x512xf32>
    %42 = tpu.matmul %40, %41, %cst_22 {dimension_numbers = #tpu.dot_dimension_numbers<[1], [0], [0], [1], [0, 0, 1, 1], [], []>} : vector<8x64xbf16>, vector<64x512xbf16>, vector<8x512xf32> -> vector<8x512xf32>
    %43 = vector.extract_strided_slice %42 {offsets = [0, 0], sizes = [3, 512], strides = [1, 1]} : vector<8x512xf32> to vector<3x512xf32>
    %c232 = arith.constant 232 : index
    %c0_23 = arith.constant 0 : index
    %44 = vector.load %arg4[%c232, %c0_23] : memref<240x1xf32, #tpu.memory_space<vmem>>, vector<3x1xf32>
    %45 = vector.broadcast %44 : vector<3x1xf32> to vector<3x512xf32>
    %46 = arith.addf %43, %45 : vector<3x512xf32>
    %cst_24 = arith.constant 1.000000e+00 : f32
    %47 = vector.broadcast %cst_24 : f32 to vector<1x512xf32>
    %48 = arith.subf %23, %47 : vector<1x512xf32>
    %cst_25 = arith.constant 0.000000e+00 : f32
    %49 = vector.broadcast %cst_25 : f32 to vector<1x512xf32>
    %50 = arith.maximumf %48, %49 : vector<1x512xf32>
    %51 = math.absf %48 : vector<1x512xf32>
    %cst_26 = arith.constant 0.000000e+00 : f32
    %52 = vector.broadcast %cst_26 : f32 to vector<1x512xf32>
    %53 = arith.subf %52, %51 : vector<1x512xf32>
    %54 = math.exp %53 : vector<1x512xf32>
    %55 = math.log1p %54 : vector<1x512xf32>
    %56 = arith.addf %50, %55 : vector<1x512xf32>
    %cst_27 = arith.constant 0.000000e+00 : f32
    %57 = vector.broadcast %cst_27 : f32 to vector<3x512xf32>
    %58 = arith.subf %57, %46 : vector<3x512xf32>
    %59 = math.exp %58 : vector<3x512xf32>
    %cst_28 = arith.constant 1.000000e+00 : f32
    %60 = vector.broadcast %cst_28 : f32 to vector<3x512xf32>
    %61 = arith.addf %60, %59 : vector<3x512xf32>
    %62 = tpu.reciprocal %61 {approx = true} : vector<3x512xf32> -> vector<3x512xf32>
    %63 = tpu.concatenate %56, %62 in 0 : vector<1x512xf32>, vector<3x512xf32> -> vector<4x512xf32>
    %c0_29 = arith.constant 0 : index
    %c0_30 = arith.constant 0 : index
    %64 = vector.load %arg5[%c0_29, %c0_30] : memref<4x512xf32, #tpu.memory_space<vmem>>, vector<4x512xf32>
    tpu.vector_store %arg5[%c0_29, %c0_30], %63 {strides = array<i32>} : memref<4x512xf32, #tpu.memory_space<vmem>>, vector<4x512xf32>,
    return
  }
  func.func @transform_0(%arg0: i32) -> (i32, i32) {
    %c0_i32 = arith.constant 0 : i32
    %c0_i32_0 = arith.constant 0 : i32
    return %c0_i32, %arg0 : i32, i32
  }
  func.func @transform_1(%arg0: i32) -> (i32, i32) {
    %c0_i32 = arith.constant 0 : i32
    %c0_i32_0 = arith.constant 0 : i32
    %c0_i32_1 = arith.constant 0 : i32
    return %c0_i32, %c0_i32_0 : i32, i32
  }
  func.func @transform_2(%arg0: i32) -> (i32, i32) {
    %c0_i32 = arith.constant 0 : i32
    %c0_i32_0 = arith.constant 0 : i32
    %c0_i32_1 = arith.constant 0 : i32
    return %c0_i32, %c0_i32_0 : i32, i32
  }
  func.func @transform_3(%arg0: i32) -> (i32, i32) {
    %c0_i32 = arith.constant 0 : i32
    %c0_i32_0 = arith.constant 0 : i32
    %c0_i32_1 = arith.constant 0 : i32
    return %c0_i32, %c0_i32_0 : i32, i32
  }
  func.func @transform_4(%arg0: i32) -> (i32, i32) {
    %c0_i32 = arith.constant 0 : i32
    %c0_i32_0 = arith.constant 0 : i32
    return %c0_i32, %arg0 : i32, i32
  }
}

</mosaic_0001>

<bundles_post_ra>
// kernel: tpu_custom_call.1
= control target key start
LH: loop header
LB: loop body
LE: loop exit
PB: predicated region body
PF: predicated region fallthrough
CT: control target
= control target key end

     0   :  { %9 = vsyncpa [#allocation3], 0  ;;  %s2620_s0 = inlined_call_operand.hbm [shape: bf16[32,4096], index: 0, kind: input, shape index: {}]   ;;  %s2621_s1 = inlined_call_operand.vmem [shape: bf16[168,32], index: 1, kind: input, shape index: {}]   ;;  %s2622_s2 = inlined_call_operand.vmem [shape: bf16[136,64], index: 2, kind: input, shape index: {}]   ;;  %s2623_s3 = inlined_call_operand.vmem [shape: f32[240,1], index: 3, kind: input, shape index: {}]   ;;  %s2624_s4 = inlined_call_operand.hbm [shape: f32[4,4096], index: 4, kind: output, shape index: {}]  }
   0x1   :  { %11 = vsyncpa [#allocation3 + $0x1], 0 }
   0x2   :  { %12 = vsyncpa [#allocation4], 0 }
   0x3   :  { %14 = vsyncpa [#allocation4 + $0x1], 0  ;;  %s2177_s15 = smov 0   ;;  %s2179_s16 = smov 0  }
   0x4   :  { %s2181_s17 = smov 0   ;;  %s2183_s18 = smov 0  }
   0x5 LB: > { %s2198_s19 = sadd.s32 4294967295, %s2144_s18   ;;  %s1814_s20 = sadd.s32 4294967294, %s2144_s18   ;;  %s2144_s18 = sphi %s2183_s18, %s2643_s18   ;;  %s2140_s17 = sphi %s2181_s17, %s2642_s17   ;;  %s2136_s16 = sphi %s2179_s16, %s2641_s16   ;;  %s2132_s15 = sphi %s2177_s15, %s2640_s15  }
   0x6   : > { %s2202_s21 = sadd.s32 1, %s2144_s18   ;;  %s27_s22 = sadd.s32 1, %s2140_s17 }
   0x7   : > { %s24_s23 = ssub.s32 %s2144_s18, %s2202_s21  ;;  %p34_p0 = scmp.ne.s32.totalorder %s2140_s17, %s2136_s16 }
   0x8   : > { %p25_p1 = scmp.eq.s32.totalorder %s24_s23, 0  ;;  %p35_p2 = scmp.eq.s32.totalorder %s2144_s18, 0 }
   0x9   : > { %p40_p3 = scmp.ne.s32.totalorder %s2136_s16, %s2132_s15  ;;  %p41_p4 = scmp.eq.s32.totalorder %s2198_s19, 0 }
   0xa   : > { %s2214_s24 = scalar_select %p25_p1, %s2140_s17, %s27_s22  }
   0xb   : > { %p2216_p5 = por %p35_p2, %p34_p0  ;;  %p2220_p6 = por %p41_p4, %p40_p3 }
   0xc   : > { %p127_p7 = scmp.eq.s32.totalorder %s2198_s19, 7  ;;  %p133_p8 = scmp.eq.s32.totalorder %s1814_s20, 7 }
   0xd   : > { %p1945_p9 = scmp.lt.s32.totalorder %s2144_s18, 8  ;;  %s162_s29 = sand.u32 1, %s2140_s17  }
   0xe   : > { %p2226_p10 = por %p127_p7, %p34_p0  ;;  %p2230_p11 = por %p133_p8, %p40_p3 }
   0xf   : > { %s1899_s30 = sshll.u32 %s2144_s18, 8  ;;  %s1817_s5 = sshll.u32 %s162_s29, 6 }
  0x10   : > { %s2628_s27 = scalar_select %p2226_p10, 1, 0 }
  0x11   : > { %s2629_s28 = scalar_select %p2230_p11, 1, 0 }
  0x12   : > { %s2239_s8 = scalar_lea.hbm %s2620_s0, %s1899_s30  ;;  %s166_s9 = scalar_lea.vmem [#allocation2], %s1817_s5 }
  0x13   : > { %s173_s10 = sshll.u32 %s166_s9, 4  ;;  %p2243_p12 = pnand %p1945_p9, %p2216_p5  ;;  %s2247_s10 = int_to_ptr.vmem [resolvable:$true] %s173_s10 }
  0x14   : > { %s2250_s12 = scalar_lea.sflag [#allocation3], %s162_s29  ;;  %s2048_s13 = scalar_lea.hbm %s2239_s8, 1024 }
  0x15   : > { %p2049_p0 = scmp.ne.s32.totalorder %s2239_s8, %s2048_s13  ;;  %p2050_p1 = pneg %p2243_p12 }
  0x16   : > { %s2053_s22 = scalar_lea.hbm %s2620_s0, 8192  ;;  %p2054_p4 = scmp.lt.u32.totalorder %s2239_s8, %s2620_s0 }
  0x17   : > { %p2051_p2 = pnand %p2050_p1, %p2049_p0  ;;  %p2055_p5 = scmp.lt.u32.totalorder %s2053_s22, %s2048_s13 }
  0x18   : > { %p2057_p8 = scmp.lt.u32.totalorder %s2048_s13, %s2239_s8 }
  0x19   : > { %p2052_p3 = pneg %p2051_p2  ;;  %p2056_p7 = por %p2055_p5, %p2054_p4 }
  0x1b   : > { %p2058_p9 = por %p2057_p8, %p2056_p7 }
  0x1d   : > { %p2059_p13 = pnand %p2058_p9, %p2052_p3 }
  0x1f   : > { %2062 = shalt.err (!%p2059_p13)
}
  0x20   : > { %s2063_s29 = scalar_lea.vmem %s2247_s10, 1024  ;;  %s2146_s30 = smov [#allocation2]  }
  0x21   : > { %p2064_p0 = scmp.ne.s32.totalorder %s2247_s10, %s2063_s29  ;;  %s2068_s5 = sshll.u32 %s2146_s30, 4  ;;  %s2069_s5 = int_to_ptr.vmem [resolvable:$false] %s2068_s5 }
  0x22   : > { %s2070_s6 = scalar_lea.vmem %s2069_s5, 2048  ;;  %p2071_p10 = scmp.lt.s32.totalorder %s2247_s10, %s2069_s5 }
  0x23   : > { %p2066_p2 = pnand %p2064_p0, %p2050_p1  ;;  %p2072_p4 = scmp.lt.s32.totalorder %s2070_s6, %s2063_s29 }
  0x25   : > { %p2067_p11 = pneg %p2066_p2  ;;  %p2073_p5 = por %p2072_p4, %p2071_p10 }
  0x27   : > { %p2074_p7 = pnand %p2073_p5, %p2067_p11 }
  0x29   : > { %2077 = shalt.err (!%p2074_p7)
}
  0x2a   : > { %s2147_s7 = smov 2048   ;;  %s2148_s9 = smov 256  }
  0x2b   : > { %s2149_s13 = smov 16   ;;  %p181_p13 = scmp.lt.s32.totalorder %s2144_s18, 9 }
  0x2c   : > { %1940 = dma.hbm_to_vmem [thread:$0]  (!%p2243_p12), %s2239_s8, 1024, %s2247_s10, %s2250_s12, %s2147_s7, %s2148_s9, %s2149_s13  }
  0x2d   : > { %p2631_p1 = scmp.ge.s32.totalorder %s2144_s18, 1 }
  0x2f   : > { %p182_p3 = pnand %p2631_p1, %p181_p13 }
  0x30   : > { %s2282_s14 = sand.u32 (!%p182_p3), 1, %s2136_s16  }
  0x31   : > { %185 = sbr.rel (%p182_p3) target bundleno = 1312 (0x520), region = 36  ;;  %s1821_s20 = sshll.u32 (!%p182_p3), %s2282_s14, 6 }
  0x32   : > { %s188_s22 = scalar_lea.sflag (!%p182_p3), [#allocation3], %s2282_s14  ;;  %s191_s23 = scalar_lea.vmem (!%p182_p3), [#allocation2], %s1821_s20 }
  0x38   : > { %2123 = dma.done.wait (%p2220_p6), %s188_s22, 1024  }
  0x39   : > { %2125 = vsyncadd (%p2220_p6), %s188_s22, 4294966272  ;;  %v2150_v0 = vmov 0   ;;  %v1985_v1 = vld [vmem:[%s191_s23 + $0x4] ss:$16 sps:$4 sm:$0xff]   ;;  %v1987_v2 = vld [vmem:[%s191_s23 + $0xc] ss:$16 sps:$4 sm:$0xff]  }
  0x3a   : > { %360 = vmatprep.mubr.bf16.mxu0 %v2150_v0  ;;  %453 = vmatprep.mubr.bf16.mxu1 %v2150_v0  ;;  %v1989_v3 = vld [vmem:[%s191_s23] ss:$16 sps:$4 sm:$0xff]   ;;  %v1990_v4 = vld [vmem:[%s191_s23 + $0x8] ss:$16 sps:$4 sm:$0xff]   ;;  %v1991_v5 = vld [vmem:[%s191_s23 + $0x24] ss:$16 sps:$4 sm:$0xff]  }
  0x3b   : > { %1983 = vset.pattern.permute.xlu0 %v2150_v0  ;;  %1984 = vset.pattern.permute.xlu1 %v2150_v0  ;;  %v1993_v6 = vld [vmem:[%s191_s23 + $0x2c] ss:$16 sps:$4 sm:$0xff]   ;;  %v1995_v7 = vld [vmem:[%s191_s23 + $0x20] ss:$16 sps:$4 sm:$0xff]   ;;  %v1996_v8 = vld [vmem:[%s191_s23 + $0x28] ss:$16 sps:$4 sm:$0xff]  }
  0x3c   : > { %328 = vmatprep.subr.bf16.mxu0 %v1985_v1  ;;  %421 = vmatprep.subr.bf16.mxu1 %v1987_v2  ;;  %v1997_v9 = vld [vmem:[%s2621_s1] sm:$0xff]   ;;  %vm309_vm0 = vcmask 261120   ;;  %v516_v11 = vld [vmem:[%s2623_s3 + $0x10] sm:$0xff]  ;;  %v515_v12 = vld [vmem:[%s2623_s3 + $0x8] sm:$0xff]  ;;  %vm1033_vm1 = vcmask 523264   ;;  %s1822_s12 = sshll.u32 %s2282_s14, 4 }
  0x3d   : > { %329 = vmatpush1.bf16.msra.mxu0 %v1989_v3  ;;  %422 = vmatpush1.bf16.msra.mxu1 %v1990_v4  ;;  %v514_v10 = vld [vmem:[%s2623_s3] sm:$0xff]  ;;  %v517_v13 = vld [vmem:[%s2623_s3 + $0x18] sm:$0xff]  ;;  %v1998_v15 = vld [vmem:[%s2621_s1 + $0x8] sm:$0xff]   ;;  %vm1714_vm6 = vcmask 1040384   ;;  %s1900_s25 = sshll.u32 %s2198_s19, 8  ;;  %s215_s29 = scalar_lea.vmem [#allocation5], %s1822_s12 }
  0x3e   : > { %330 = vmatprep.subr.bf16.mxu0 %v1991_v5  ;;  %423 = vmatprep.subr.bf16.mxu1 %v1993_v6  ;;  %v819_v14 = vld [vmem:[%s2623_s3 + $0x20] sm:$0xff]  ;;  %v820_v16 = vld [vmem:[%s2623_s3 + $0x28] sm:$0xff]  ;;  %v821_v17 = vld [vmem:[%s2623_s3 + $0x30] sm:$0xff]  ;;  %s1744_s30 = sshll.u32 %s215_s29, 4  ;;  %s2577_s7 = scalar_lea.hbm %s2624_s4, %s1900_s25  ;;  %s2579_s30 = int_to_ptr.vmem [resolvable:$true] %s1744_s30 }
  0x3f   : > { %520 = vperm.xlu0 %1983, %v514_v10   ;;  %530 = vperm.xlu1 %1984, %v516_v11   ;;  %v822_v18 = vld [vmem:[%s2623_s3 + $0x38] sm:$0xff]  ;;  %v823_v19 = vld [vmem:[%s2623_s3 + $0x40] sm:$0xff]  ;;  %v824_v20 = vld [vmem:[%s2623_s3 + $0x48] sm:$0xff]  ;;  %s1730_s19 = scalar_lea.sflag [#allocation4], %s2282_s14  ;;  %s2078_s9 = scalar_lea.vmem %s2579_s30, 256 }
  0x40   : > { %v825_v21 = vld [vmem:[%s2623_s3 + $0x50] sm:$0xff]  ;;  %v826_v22 = vld [vmem:[%s2623_s3 + $0x58] sm:$0xff]  ;;  %v965_v23 = vld [vmem:[%s2623_s3 + $0x68] sm:$0xff]  ;;  %p2079_p6 = scmp.ne.s32.totalorder %s2579_s30, %s2078_s9  ;;  %p2638_p10 = scmp.ne.s32.totalorder %s2628_s27, 0 }
  0x41   : > { %331 = vmatpush1.bf16.msra.mxu0 %v1995_v7  ;;  %424 = vmatpush1.bf16.msra.mxu1 %v1996_v8  ;;  %v966_v24 = vld [vmem:[%s2623_s3 + $0x70] sm:$0xff]  ;;  %v967_v25 = vld [vmem:[%s2623_s3 + $0x78] sm:$0xff]  ;;  %v968_v26 = vld [vmem:[%s2623_s3 + $0x80] sm:$0xff]  ;;  %s2151_s13 = smov [#allocation5]  }
  0x42   : > { %v969_v27 = vld [vmem:[%s2623_s3 + $0x88] sm:$0xff]  ;;  %v970_v28 = vld [vmem:[%s2623_s3 + $0x90] sm:$0xff]  ;;  %v971_v29 = vld [vmem:[%s2623_s3 + $0x98] sm:$0xff]  ;;  %p2080_p11 = pnand %p2079_p6, %p2638_p10  ;;  %s2082_s20 = sshll.u32 %s2151_s13, 4  ;;  %s2083_s20 = int_to_ptr.vmem [resolvable:$false] %s2082_s20 }
  0x43   : > { %525 = vperm.xlu0 %1983, %v515_v12   ;;  %535 = vperm.xlu1 %1984, %v517_v13   ;;  %v972_v30 = vld [vmem:[%s2623_s3 + $0xa0] sm:$0xff]  ;;  %v1248_v31 = vld [vmem:[%s2623_s3 + $0xa8] sm:$0xff]  ;;  %v1249_v32 = vld [vmem:[%s2623_s3 + $0xb0] sm:$0xff]  ;;  %s2084_s22 = scalar_lea.vmem %s2083_s20, 512  ;;  %p2085_p8 = scmp.lt.s32.totalorder %s2579_s30, %s2083_s20 }
  0x44   : > { %1837 = vmatmul.mubr.msk.bf16.vlgmr.msra.gmra.mrb[0].mxu0 %vm309_vm0, %v1997_v9  ;;  %1843 = vmatmul.mubr.msk.bf16.vlgmr.msra.gmra.mrb[0].mxu1 %vm309_vm0, %v1997_v9  ;;  %v1250_v33 = vld [vmem:[%s2623_s3 + $0xb8] sm:$0xff]  ;;  %v1251_v34 = vld [vmem:[%s2623_s3 + $0xc0] sm:$0xff]  ;;  %v1999_v35 = vld [vmem:[%s2621_s1 + $0x10] sm:$0xff]   ;;  %p2081_p12 = pneg %p2080_p11  ;;  %p2086_p9 = scmp.lt.s32.totalorder %s2084_s22, %s2078_s9 }
  0x45   : > { %370 = vmatprep.mubr.bf16.mxu0 %v2150_v0  ;;  %463 = vmatprep.mubr.bf16.mxu1 %v2150_v0  ;;  %v1252_v36 = vld [vmem:[%s2623_s3 + $0xc8] sm:$0xff]  ;;  %v1253_v37 = vld [vmem:[%s2623_s3 + $0xd0] sm:$0xff]  ;;  %v1254_v38 = vld [vmem:[%s2623_s3 + $0xd8] sm:$0xff] }
  0x46   : > { %v1255_v39 = vld [vmem:[%s2623_s3 + $0xe0] sm:$0xff]  ;;  %v2000_v40 = vld [vmem:[%s2621_s1 + $0x18] sm:$0xff]   ;;  %v1608_v42 = vld [vmem:[%s2623_s3 + $0xe8] sm:$0x7]  ;;  %p2087_p0 = por %p2086_p9, %p2085_p8 }
  0x47   : > { %829 = vperm.xlu0 %1983, %v819_v14   ;;  %834 = vperm.xlu1 %1984, %v820_v16   ;;  %v931_v41 = vld [vmem:[%s2623_s3 + $0x60] sm:$0x1]  ;;  %v2002_v44 = vld [vmem:[%s2621_s1 + $0x28] sm:$0xff]  }
  0x48   : > { %v2001_v43 = vld [vmem:[%s2621_s1 + $0x20] sm:$0xff]   ;;  %p2088_p2 = pnand %p2087_p0, %p2081_p12 }
  0x4b   : > { %839 = vperm.xlu0 %1983, %v821_v17   ;;  %844 = vperm.xlu1 %1984, %v822_v18  }
  0x4c   : > { %1838 = vmatmul.mubr.msk.bf16.gmra.mrb[4].mxu0 %vm309_vm0, %v1998_v15  ;;  %1844 = vmatmul.mubr.msk.bf16.gmra.mrb[4].mxu1 %vm309_vm0, %v1998_v15 }
  0x4d   : > { %380 = vmatprep.mubr.bf16.mxu0 %v2150_v0  ;;  %473 = vmatprep.mubr.bf16.mxu1 %v2150_v0 }
  0x4f   : > { %849 = vperm.xlu0 %1983, %v823_v19   ;;  %854 = vperm.xlu1 %1984, %v824_v20  }
  0x53   : > { %859 = vperm.xlu0 %1983, %v825_v21   ;;  %864 = vperm.xlu1 %1984, %v826_v22  }
  0x54   : > { %1839 = vmatmul.mubr.msk.bf16.gmra.mrb[8].mxu0 %vm309_vm0, %v1999_v35  ;;  %1845 = vmatmul.mubr.msk.bf16.gmra.mrb[8].mxu1 %vm309_vm0, %v1999_v35 }
  0x55   : > { %390 = vmatprep.mubr.bf16.mxu0 %v2150_v0  ;;  %483 = vmatprep.mubr.bf16.mxu1 %v2150_v0 }
  0x57   : > { %975 = vperm.xlu0 %1983, %v965_v23   ;;  %980 = vperm.xlu1 %1984, %v966_v24  }
  0x5b   : > { %985 = vperm.xlu0 %1983, %v967_v25   ;;  %990 = vperm.xlu1 %1984, %v968_v26  }
  0x5c   : > { %1840 = vmatmul.mubr.msk.bf16.gmra.mrb[12].mxu0 %vm309_vm0, %v2000_v40  ;;  %1846 = vmatmul.mubr.msk.bf16.gmra.mrb[12].mxu1 %vm309_vm0, %v2000_v40 }
  0x5d   : > { %400 = vmatprep.mubr.bf16.mxu0 %v2150_v0  ;;  %493 = vmatprep.mubr.bf16.mxu1 %v2150_v0 }
  0x5f   : > { %995 = vperm.xlu0 %1983, %v969_v27   ;;  %1000 = vperm.xlu1 %1984, %v970_v28  }
  0x63   : > { %1005 = vperm.xlu0 %1983, %v971_v29   ;;  %1010 = vperm.xlu1 %1984, %v972_v30  }
  0x64   : > { %1841 = vmatmul.mubr.msk.bf16.gmra.mrb[16].mxu0 %vm309_vm0, %v2001_v43  ;;  %1847 = vmatmul.mubr.msk.bf16.gmra.mrb[16].mxu1 %vm309_vm0, %v2001_v43  ;;  %v2004_v43 = vld [vmem:[%s2621_s1 + $0x38] sm:$0xff]  }
  0x65   : > { %410 = vmatprep.mubr.bf16.mxu0 %v2150_v0  ;;  %503 = vmatprep.mubr.bf16.mxu1 %v2150_v0 }
  0x67   : > { %1258 = vperm.xlu0 %1983, %v1248_v31   ;;  %1263 = vperm.xlu1 %1984, %v1249_v32  }
  0x6b   : > { %1268 = vperm.xlu0 %1983, %v1250_v33   ;;  %1273 = vperm.xlu1 %1984, %v1251_v34  }
  0x6c   : > { %1842 = vmatmul.mubr.msk.bf16.gmra.mrb[20].mxu0 %vm309_vm0, %v2002_v44  ;;  %1848 = vmatmul.mubr.msk.bf16.gmra.mrb[20].mxu1 %vm309_vm0, %v2002_v44  ;;  %v2005_v44 = vld [vmem:[%s2621_s1 + $0x40] sm:$0xff]  }
  0x6d   : > { %657 = vmatprep.mubr.bf16.mxu0 %v2150_v0  ;;  %738 = vmatprep.mubr.bf16.mxu1 %v2150_v0 }
  0x6f   : > { %1278 = vperm.xlu0 %1983, %v1252_v36   ;;  %1283 = vperm.xlu1 %1984, %v1253_v37  }
  0x73   : > { %1288 = vperm.xlu0 %1983, %v1254_v38   ;;  %1293 = vperm.xlu1 %1984, %v1255_v39  }
  0x77   : > { %934 = vperm.xlu0 %1983, %v931_v41   ;;  %1611 = vperm.xlu1 %1984, %v1608_v42   ;;  %v2003_v42 = vld [vmem:[%s2621_s1 + $0x30] sm:$0xff]  }
  0xbe   : > { %v521_v45 = vpop.permute.xlu0 %520  ;;  %v531_v47 = vpop.permute.xlu1 %530 }
  0xc2   : > { %v526_v46 = vpop.permute.xlu0 %525  ;;  %v536_v9 = vpop.permute.xlu1 %535 }
 0x117   : > { %v362_v48 = vpop.f32.mrb[0].mxu0  ;;  %v455_v49 = vpop.f32.mrb[0].mxu1 }
 0x118   : > { %v538_v50 = vadd.f32 %v521_v45, %v362_v48  ;;  %v540_v51 = vadd.f32 %v521_v45, %v455_v49  ;;  %v364_v52 = vpop.f32.mrb[1].mxu0  ;;  %v457_v53 = vpop.f32.mrb[1].mxu1 }
 0x119   : > { %v539_v54 = vadd.f32 %v521_v45, %v364_v52  ;;  %v541_v55 = vadd.f32 %v521_v45, %v457_v53  ;;  %v366_v56 = vpop.f32.mrb[2].mxu0  ;;  %v459_v57 = vpop.f32.mrb[2].mxu1  ;;  %v2006_v45 = vld [vmem:[%s2621_s1 + $0x48] sm:$0xff]  }
 0x11a   : > { %v542_v58 = vadd.f32 %v526_v46, %v366_v56  ;;  %v544_v59 = vadd.f32 %v526_v46, %v459_v57  ;;  %v368_v60 = vpop.f32.mrb[3].mxu0  ;;  %v461_v61 = vpop.f32.mrb[3].mxu1  ;;  %v554_v1 = vmax.f32 %v538_v50, 0.0  ;;  %v556_v2 = vmax.f32 %v540_v51, 0.0 }
 0x11b   : > { %v543_v62 = vadd.f32 %v526_v46, %v368_v60  ;;  %v545_v63 = vadd.f32 %v526_v46, %v461_v61  ;;  %v555_v5 = vmax.f32 %v539_v54, 0.0  ;;  %v557_v6 = vmax.f32 %v541_v55, 0.0  ;;  %v2007_v46 = vld [vmem:[%s2621_s1 + $0x50] ss:$0 sps:$4 sm:$0xff]   ;;  %v835_v48 = vpop.permute.xlu1 %834 }
 0x11c   : > { %v558_v3 = vmax.f32 %v542_v58, 0.0  ;;  %v560_v4 = vmax.f32 %v544_v59, 0.0 }
 0x11d   : > { %v559_v7 = vmax.f32 %v543_v62, 0.0  ;;  %v561_v8 = vmax.f32 %v545_v63, 0.0 }
 0x11e   : > { %v579_v10 = vpack.c.bf16 %v558_v3, %v554_v1  ;;  %v581_v11 = vpack.c.bf16 %v560_v4, %v556_v2 }
 0x11f   : > { %v580_v12 = vpack.c.bf16 %v559_v7, %v555_v5  ;;  %v582_v13 = vpack.c.bf16 %v561_v8, %v557_v6  ;;  %v372_v14 = vpop.f32.mrb[4].mxu0  ;;  %v465_v15 = vpop.f32.mrb[4].mxu1 }
 0x120   : > { %v546_v16 = vadd.f32 %v531_v47, %v372_v14  ;;  %v548_v17 = vadd.f32 %v531_v47, %v465_v15  ;;  %v374_v18 = vpop.f32.mrb[5].mxu0  ;;  %v467_v19 = vpop.f32.mrb[5].mxu1 }
 0x121   : > { %v547_v20 = vadd.f32 %v531_v47, %v374_v18  ;;  %v549_v21 = vadd.f32 %v531_v47, %v467_v19  ;;  %v376_v22 = vpop.f32.mrb[6].mxu0  ;;  %v469_v23 = vpop.f32.mrb[6].mxu1  ;;  %625 = vmatprep.subr.bf16.mxu0 %v580_v12  ;;  %706 = vmatprep.subr.bf16.mxu1 %v582_v13 }
 0x122   : > { %v550_v24 = vadd.f32 %v536_v9, %v376_v22  ;;  %v552_v25 = vadd.f32 %v536_v9, %v469_v23  ;;  %v378_v26 = vpop.f32.mrb[7].mxu0  ;;  %v471_v27 = vpop.f32.mrb[7].mxu1  ;;  %626 = vmatpush1.bf16.msra.mxu0 %v579_v10  ;;  %707 = vmatpush1.bf16.msra.mxu1 %v581_v11  ;;  %v562_v30 = vmax.f32 %v546_v16, 0.0  ;;  %v564_v31 = vmax.f32 %v548_v17, 0.0 }
 0x123   : > { %v551_v28 = vadd.f32 %v536_v9, %v378_v26  ;;  %v553_v29 = vadd.f32 %v536_v9, %v471_v27  ;;  %v563_v34 = vmax.f32 %v547_v20, 0.0  ;;  %v565_v35 = vmax.f32 %v549_v21, 0.0  ;;  %v830_v47 = vpop.permute.xlu0 %829  ;;  %v845_v11 = vpop.permute.xlu1 %844 }
 0x124   : > { %v566_v32 = vmax.f32 %v550_v24, 0.0  ;;  %v568_v33 = vmax.f32 %v552_v25, 0.0 }
 0x125   : > { %v567_v36 = vmax.f32 %v551_v28, 0.0  ;;  %v569_v37 = vmax.f32 %v553_v29, 0.0 }
 0x126   : > { %v583_v38 = vpack.c.bf16 %v566_v32, %v562_v30  ;;  %v585_v39 = vpack.c.bf16 %v568_v33, %v564_v31 }
 0x127   : > { %v584_v40 = vpack.c.bf16 %v567_v36, %v563_v34  ;;  %v586_v41 = vpack.c.bf16 %v569_v37, %v565_v35  ;;  %v840_v10 = vpop.permute.xlu0 %839 }
 0x129   : > { %627 = vmatprep.subr.bf16.mxu0 %v584_v40  ;;  %708 = vmatprep.subr.bf16.mxu1 %v586_v41  ;;  %v855_v41 = vpop.permute.xlu1 %854 }
 0x12a   : > { %628 = vmatpush1.bf16.msra.mxu0 %v583_v38  ;;  %709 = vmatpush1.bf16.msra.mxu1 %v585_v39 }
 0x12b   : > { %v850_v40 = vpop.permute.xlu0 %849 }
 0x12d   : > { %1854 = vmatmul.mubr.msk.bf16.vlgmr.msra.gmra.mrb[8].mxu0 %vm309_vm0, %v2003_v42  ;;  %1859 = vmatmul.mubr.msk.bf16.vlgmr.msra.gmra.mrb[8].mxu1 %vm309_vm0, %v2003_v42 }
 0x12e   : > { %667 = vmatprep.mubr.bf16.mxu0 %v2150_v0  ;;  %748 = vmatprep.mubr.bf16.mxu1 %v2150_v0 }
 0x135   : > { %1855 = vmatmul.mubr.msk.bf16.gmra.mrb[12].mxu0 %vm309_vm0, %v2004_v43  ;;  %1860 = vmatmul.mubr.msk.bf16.gmra.mrb[12].mxu1 %vm309_vm0, %v2004_v43 }
 0x136   : > { %677 = vmatprep.mubr.bf16.mxu0 %v2150_v0  ;;  %758 = vmatprep.mubr.bf16.mxu1 %v2150_v0 }
 0x13d   : > { %1856 = vmatmul.mubr.msk.bf16.gmra.mrb[16].mxu0 %vm309_vm0, %v2005_v44  ;;  %1861 = vmatmul.mubr.msk.bf16.gmra.mrb[16].mxu1 %vm309_vm0, %v2005_v44 }
 0x13e   : > { %687 = vmatprep.mubr.bf16.mxu0 %v2150_v0  ;;  %768 = vmatprep.mubr.bf16.mxu1 %v2150_v0 }
 0x145   : > { %1857 = vmatmul.mubr.msk.bf16.gmra.mrb[20].mxu0 %vm309_vm0, %v2006_v45  ;;  %1862 = vmatmul.mubr.msk.bf16.gmra.mrb[20].mxu1 %vm309_vm0, %v2006_v45 }
 0x146   : > { %697 = vmatprep.mubr.bf16.mxu0 %v2150_v0  ;;  %778 = vmatprep.mubr.bf16.mxu1 %v2150_v0 }
 0x14d   : > { %1858 = vmatmul.mubr.msk.bf16.gmra.mrb[24].mxu0 %vm309_vm0, %v2007_v46  ;;  %1863 = vmatmul.mubr.msk.bf16.gmra.mrb[24].mxu1 %vm309_vm0, %v2007_v46 }
 0x14e   : > { %1078 = vmatprep.mubr.bf16.mxu0 %v2150_v0  ;;  %1151 = vmatprep.mubr.bf16.mxu1 %v2150_v0 }
 0x200   : > { %v659_v49 = vpop.f32.mrb[8].mxu0  ;;  %v740_v50 = vpop.f32.mrb[8].mxu1 }
 0x201   : > { %v867_v51 = vadd.f32 %v830_v47, %v659_v49  ;;  %v869_v52 = vadd.f32 %v830_v47, %v740_v50  ;;  %v661_v53 = vpop.f32.mrb[9].mxu0  ;;  %v742_v54 = vpop.f32.mrb[9].mxu1 }
 0x202   : > { %v868_v55 = vadd.f32 %v830_v47, %v661_v53  ;;  %v870_v56 = vadd.f32 %v830_v47, %v742_v54  ;;  %v663_v57 = vpop.f32.mrb[10].mxu0  ;;  %v744_v58 = vpop.f32.mrb[10].mxu1 }
 0x203   : > { %v871_v59 = vadd.f32 %v835_v48, %v663_v57  ;;  %v873_v60 = vadd.f32 %v835_v48, %v744_v58  ;;  %v665_v61 = vpop.f32.mrb[11].mxu0  ;;  %v746_v62 = vpop.f32.mrb[11].mxu1  ;;  %v899_v2 = vmax.f32 %v867_v51, 0.0  ;;  %v901_v3 = vmax.f32 %v869_v52, 0.0 }
 0x204   : > { %v872_v63 = vadd.f32 %v835_v48, %v665_v61  ;;  %v874_v1 = vadd.f32 %v835_v48, %v746_v62  ;;  %v900_v6 = vmax.f32 %v868_v55, 0.0  ;;  %v902_v7 = vmax.f32 %v870_v56, 0.0 }
 0x205   : > { %v903_v4 = vmax.f32 %v871_v59, 0.0  ;;  %v905_v5 = vmax.f32 %v873_v60, 0.0 }
 0x206   : > { %v904_v8 = vmax.f32 %v872_v63, 0.0  ;;  %v906_v9 = vmax.f32 %v874_v1, 0.0 }
 0x207   : > { %v949_v12 = vpack.c.bf16 %v903_v4, %v899_v2  ;;  %v951_v13 = vpack.c.bf16 %v905_v5, %v901_v3 }
 0x208   : > { %v950_v14 = vpack.c.bf16 %v904_v8, %v900_v6  ;;  %v952_v15 = vpack.c.bf16 %v906_v9, %v902_v7  ;;  %v669_v16 = vpop.f32.mrb[12].mxu0  ;;  %v750_v17 = vpop.f32.mrb[12].mxu1 }
 0x209   : > { %v875_v18 = vadd.f32 %v840_v10, %v669_v16  ;;  %v877_v19 = vadd.f32 %v840_v10, %v750_v17  ;;  %v671_v20 = vpop.f32.mrb[13].mxu0  ;;  %v752_v21 = vpop.f32.mrb[13].mxu1 }
 0x20a   : > { %v876_v22 = vadd.f32 %v840_v10, %v671_v20  ;;  %v878_v23 = vadd.f32 %v840_v10, %v752_v21  ;;  %v673_v24 = vpop.f32.mrb[14].mxu0  ;;  %v754_v25 = vpop.f32.mrb[14].mxu1  ;;  %1046 = vmatprep.subr.bf16.mxu0 %v950_v14  ;;  %1119 = vmatprep.subr.bf16.mxu1 %v952_v15 }
 0x20b   : > { %v879_v26 = vadd.f32 %v845_v11, %v673_v24  ;;  %v881_v27 = vadd.f32 %v845_v11, %v754_v25  ;;  %v675_v28 = vpop.f32.mrb[15].mxu0  ;;  %v756_v29 = vpop.f32.mrb[15].mxu1  ;;  %1047 = vmatpush1.bf16.msra.mxu0 %v949_v12  ;;  %1120 = vmatpush1.bf16.msra.mxu1 %v951_v13  ;;  %v907_v32 = vmax.f32 %v875_v18, 0.0  ;;  %v909_v33 = vmax.f32 %v877_v19, 0.0 }
 0x20c   : > { %v880_v30 = vadd.f32 %v845_v11, %v675_v28  ;;  %v882_v31 = vadd.f32 %v845_v11, %v756_v29  ;;  %v908_v36 = vmax.f32 %v876_v22, 0.0  ;;  %v910_v37 = vmax.f32 %v878_v23, 0.0  ;;  %v860_v7 = vpop.permute.xlu0 %859  ;;  %v865_v8 = vpop.permute.xlu1 %864 }
 0x20d   : > { %v911_v34 = vmax.f32 %v879_v26, 0.0  ;;  %v913_v35 = vmax.f32 %v881_v27, 0.0 }
 0x20e   : > { %v912_v38 = vmax.f32 %v880_v30, 0.0  ;;  %v914_v39 = vmax.f32 %v882_v31, 0.0 }
 0x20f   : > { %v953_v42 = vpack.c.bf16 %v911_v34, %v907_v32  ;;  %v955_v43 = vpack.c.bf16 %v913_v35, %v909_v33 }
 0x210   : > { %v954_v44 = vpack.c.bf16 %v912_v38, %v908_v36  ;;  %v956_v45 = vpack.c.bf16 %v914_v39, %v910_v37  ;;  %v679_v46 = vpop.f32.mrb[16].mxu0  ;;  %v760_v47 = vpop.f32.mrb[16].mxu1 }
 0x211   : > { %v883_v48 = vadd.f32 %v850_v40, %v679_v46  ;;  %v885_v49 = vadd.f32 %v850_v40, %v760_v47  ;;  %v681_v50 = vpop.f32.mrb[17].mxu0  ;;  %v762_v51 = vpop.f32.mrb[17].mxu1 }
 0x212   : > { %v884_v52 = vadd.f32 %v850_v40, %v681_v50  ;;  %v886_v53 = vadd.f32 %v850_v40, %v762_v51  ;;  %v683_v54 = vpop.f32.mrb[18].mxu0  ;;  %v764_v55 = vpop.f32.mrb[18].mxu1  ;;  %1048 = vmatprep.subr.bf16.mxu0 %v954_v44  ;;  %1121 = vmatprep.subr.bf16.mxu1 %v956_v45  ;;  %v2008_v45 = vld [vmem:[%s2622_s2] sm:$0xff]   ;;  %v2009_v50 = vld [vmem:[%s2622_s2 + $0x8] sm:$0xff]   ;;  %v2010_v51 = vld [vmem:[%s2622_s2 + $0x10] sm:$0xff]  }
 0x213   : > { %v887_v56 = vadd.f32 %v855_v41, %v683_v54  ;;  %v889_v57 = vadd.f32 %v855_v41, %v764_v55  ;;  %v685_v58 = vpop.f32.mrb[19].mxu0  ;;  %v766_v59 = vpop.f32.mrb[19].mxu1  ;;  %1049 = vmatpush1.bf16.msra.mxu0 %v953_v42  ;;  %1122 = vmatpush1.bf16.msra.mxu1 %v955_v43  ;;  %v915_v62 = vmax.f32 %v883_v48, 0.0  ;;  %v917_v63 = vmax.f32 %v885_v49, 0.0 }
 0x214   : > { %v888_v60 = vadd.f32 %v855_v41, %v685_v58  ;;  %v890_v61 = vadd.f32 %v855_v41, %v766_v59  ;;  %v916_v3 = vmax.f32 %v884_v52, 0.0  ;;  %v918_v4 = vmax.f32 %v886_v53, 0.0  ;;  %v2011_v52 = vld [vmem:[%s2622_s2 + $0x18] sm:$0xff]   ;;  %v976_v53 = vpop.permute.xlu0 %975  ;;  %v981_v54 = vpop.permute.xlu1 %980 }
 0x215   : > { %v919_v1 = vmax.f32 %v887_v56, 0.0  ;;  %v921_v2 = vmax.f32 %v889_v57, 0.0 }
 0x216   : > { %v920_v5 = vmax.f32 %v888_v60, 0.0  ;;  %v922_v6 = vmax.f32 %v890_v61, 0.0 }
 0x217   : > { %v957_v9 = vpack.c.bf16 %v919_v1, %v915_v62  ;;  %v959_v10 = vpack.c.bf16 %v921_v2, %v917_v63 }
 0x218   : > { %v958_v11 = vpack.c.bf16 %v920_v5, %v916_v3  ;;  %v960_v12 = vpack.c.bf16 %v922_v6, %v918_v4  ;;  %v689_v13 = vpop.f32.mrb[20].mxu0  ;;  %v770_v14 = vpop.f32.mrb[20].mxu1 }
 0x219   : > { %v891_v15 = vadd.f32 %v860_v7, %v689_v13  ;;  %v893_v16 = vadd.f32 %v860_v7, %v770_v14  ;;  %v691_v17 = vpop.f32.mrb[21].mxu0  ;;  %v772_v18 = vpop.f32.mrb[21].mxu1 }
 0x21a   : > { %v892_v19 = vadd.f32 %v860_v7, %v691_v17  ;;  %v894_v20 = vadd.f32 %v860_v7, %v772_v18  ;;  %v693_v21 = vpop.f32.mrb[22].mxu0  ;;  %v774_v22 = vpop.f32.mrb[22].mxu1  ;;  %1050 = vmatprep.subr.bf16.mxu0 %v958_v11  ;;  %1123 = vmatprep.subr.bf16.mxu1 %v960_v12 }
 0x21b   : > { %v895_v23 = vadd.f32 %v865_v8, %v693_v21  ;;  %v897_v24 = vadd.f32 %v865_v8, %v774_v22  ;;  %v695_v25 = vpop.f32.mrb[23].mxu0  ;;  %v776_v26 = vpop.f32.mrb[23].mxu1  ;;  %1051 = vmatpush1.bf16.msra.mxu0 %v957_v9  ;;  %1124 = vmatpush1.bf16.msra.mxu1 %v959_v10  ;;  %v923_v29 = vmax.f32 %v891_v15, 0.0  ;;  %v925_v30 = vmax.f32 %v893_v16, 0.0 }
 0x21c   : > { %v896_v27 = vadd.f32 %v865_v8, %v695_v25  ;;  %v898_v28 = vadd.f32 %v865_v8, %v776_v26  ;;  %v924_v33 = vmax.f32 %v892_v19, 0.0  ;;  %v926_v34 = vmax.f32 %v894_v20, 0.0  ;;  %v986_v16 = vpop.permute.xlu0 %985  ;;  %v991_v17 = vpop.permute.xlu1 %990 }
 0x21d   : > { %v927_v31 = vmax.f32 %v895_v23, 0.0  ;;  %v929_v32 = vmax.f32 %v897_v24, 0.0 }
 0x21e   : > { %v928_v35 = vmax.f32 %v896_v27, 0.0  ;;  %v930_v36 = vmax.f32 %v898_v28, 0.0 }
 0x21f   : > { %v961_v37 = vpack.c.bf16 %v927_v31, %v923_v29  ;;  %v963_v38 = vpack.c.bf16 %v929_v32, %v925_v30 }
 0x220   : > { %v962_v39 = vpack.c.bf16 %v928_v35, %v924_v33  ;;  %v964_v40 = vpack.c.bf16 %v930_v36, %v926_v34  ;;  %v2461_v41 = vpop.f32.mrb[24].mxu0  ;;  %v2463_v42 = vpop.f32.mrb[24].mxu1 }
 0x221   : > { %v2465_v43 = vpop.f32.mrb[25].mxu0  ;;  %v2467_v44 = vpop.f32.mrb[25].mxu1 }
 0x222   : > { %1052 = vmatprep.subr.bf16.mxu0 %v962_v39  ;;  %1125 = vmatprep.subr.bf16.mxu1 %v964_v40  ;;  %v703_v46 = vpop.f32.mrb[26].mxu0  ;;  %v784_v47 = vpop.f32.mrb[26].mxu1 }
 0x223   : > { %1053 = vmatpush1.bf16.msra.mxu0 %v961_v37  ;;  %1126 = vmatpush1.bf16.msra.mxu1 %v963_v38  ;;  %v704_v48 = vpop.f32.mrb[27].mxu0  ;;  %v785_v49 = vpop.f32.mrb[27].mxu1 }
 0x226   : > { %1868 = vmatmul.mubr.msk.bf16.vlgmr.msra.gmra.mrb[28].mxu0 %vm1033_vm1, %v2008_v45  ;;  %1872 = vmatmul.mubr.msk.bf16.vlgmr.msra.gmra.mrb[28].mxu1 %vm1033_vm1, %v2008_v45 }
 0x227   : > { %1088 = vmatprep.mubr.bf16.mxu0 %v2150_v0  ;;  %1161 = vmatprep.mubr.bf16.mxu1 %v2150_v0 }
 0x22e   : > { %1869 = vmatmul.mubr.msk.bf16.gmra.mrb[32].mxu0 %vm1033_vm1, %v2009_v50  ;;  %1873 = vmatmul.mubr.msk.bf16.gmra.mrb[32].mxu1 %vm1033_vm1, %v2009_v50  ;;  %v996_v50 = vpop.permute.xlu0 %995 }
 0x22f   : > { %1098 = vmatprep.mubr.bf16.mxu0 %v2150_v0  ;;  %1171 = vmatprep.mubr.bf16.mxu1 %v2150_v0 }
 0x236   : > { %1870 = vmatmul.mubr.msk.bf16.gmra.mrb[36].mxu0 %vm1033_vm1, %v2010_v51  ;;  %1874 = vmatmul.mubr.msk.bf16.gmra.mrb[36].mxu1 %vm1033_vm1, %v2010_v51  ;;  %v1001_v51 = vpop.permute.xlu1 %1000 }
 0x237   : > { %1108 = vmatprep.mubr.bf16.mxu0 %v2150_v0  ;;  %1181 = vmatprep.mubr.bf16.mxu1 %v2150_v0 }
 0x23e   : > { %1871 = vmatmul.mubr.msk.bf16.gmra.mrb[40].mxu0 %vm1033_vm1, %v2011_v52  ;;  %1875 = vmatmul.mubr.msk.bf16.gmra.mrb[40].mxu1 %vm1033_vm1, %v2011_v52 }
 0x23f   : > { %1360 = vmatprep.mubr.bf16.mxu0 %v2150_v0  ;;  %1433 = vmatprep.mubr.bf16.mxu1 %v2150_v0 }
 0x2f9   : > { %v1080_v55 = vpop.f32.mrb[28].mxu0  ;;  %v1153_v56 = vpop.f32.mrb[28].mxu1 }
 0x2fa   : > { %v1081_v57 = vadd.f32 %v1080_v55, %v976_v53  ;;  %v1154_v58 = vadd.f32 %v1153_v56, %v976_v53  ;;  %v1082_v59 = vpop.f32.mrb[29].mxu0  ;;  %v1155_v60 = vpop.f32.mrb[29].mxu1 }
 0x2fb   : > { %v1083_v61 = vadd.f32 %v1082_v59, %v976_v53  ;;  %v1156_v62 = vadd.f32 %v1155_v60, %v976_v53  ;;  %v1084_v63 = vpop.f32.mrb[30].mxu0  ;;  %v1157_v1 = vpop.f32.mrb[30].mxu1 }
 0x2fc   : > { %v1085_v2 = vadd.f32 %v1084_v63, %v981_v54  ;;  %v1158_v3 = vadd.f32 %v1157_v1, %v981_v54  ;;  %v1086_v4 = vpop.f32.mrb[31].mxu0  ;;  %v1159_v5 = vpop.f32.mrb[31].mxu1  ;;  %v1192_v8 = vmax.f32 %v1081_v57, 0.0  ;;  %v1194_v9 = vmax.f32 %v1154_v58, 0.0 }
 0x2fd   : > { %v1087_v6 = vadd.f32 %v1086_v4, %v981_v54  ;;  %v1160_v7 = vadd.f32 %v1159_v5, %v981_v54  ;;  %v1193_v12 = vmax.f32 %v1083_v61, 0.0  ;;  %v1195_v13 = vmax.f32 %v1156_v62, 0.0 }
 0x2fe   : > { %v1196_v10 = vmax.f32 %v1085_v2, 0.0  ;;  %v1198_v11 = vmax.f32 %v1158_v3, 0.0 }
 0x2ff   : > { %v1197_v14 = vmax.f32 %v1087_v6, 0.0  ;;  %v1199_v15 = vmax.f32 %v1160_v7, 0.0 }
 0x300   : > { %v1232_v18 = vpack.c.bf16 %v1196_v10, %v1192_v8  ;;  %v1234_v19 = vpack.c.bf16 %v1198_v11, %v1194_v9 }
 0x301   : > { %v1233_v20 = vpack.c.bf16 %v1197_v14, %v1193_v12  ;;  %v1235_v21 = vpack.c.bf16 %v1199_v15, %v1195_v13  ;;  %v1090_v22 = vpop.f32.mrb[32].mxu0  ;;  %v1163_v23 = vpop.f32.mrb[32].mxu1 }
 0x302   : > { %v1091_v24 = vadd.f32 %v1090_v22, %v986_v16  ;;  %v1164_v25 = vadd.f32 %v1163_v23, %v986_v16  ;;  %v1092_v26 = vpop.f32.mrb[33].mxu0  ;;  %v1165_v27 = vpop.f32.mrb[33].mxu1 }
 0x303   : > { %v1093_v28 = vadd.f32 %v1092_v26, %v986_v16  ;;  %v1166_v29 = vadd.f32 %v1165_v27, %v986_v16  ;;  %v1094_v30 = vpop.f32.mrb[34].mxu0  ;;  %v1167_v31 = vpop.f32.mrb[34].mxu1  ;;  %1328 = vmatprep.subr.bf16.mxu0 %v1233_v20  ;;  %1401 = vmatprep.subr.bf16.mxu1 %v1235_v21 }
 0x304   : > { %v1095_v32 = vadd.f32 %v1094_v30, %v991_v17  ;;  %v1168_v33 = vadd.f32 %v1167_v31, %v991_v17  ;;  %v1096_v34 = vpop.f32.mrb[35].mxu0  ;;  %v1169_v35 = vpop.f32.mrb[35].mxu1  ;;  %1329 = vmatpush1.bf16.msra.mxu0 %v1232_v18  ;;  %1402 = vmatpush1.bf16.msra.mxu1 %v1234_v19  ;;  %v1200_v38 = vmax.f32 %v1091_v24, 0.0  ;;  %v1202_v39 = vmax.f32 %v1164_v25, 0.0 }
 0x305   : > { %v1097_v36 = vadd.f32 %v1096_v34, %v991_v17  ;;  %v1170_v37 = vadd.f32 %v1169_v35, %v991_v17  ;;  %v1201_v46 = vmax.f32 %v1093_v28, 0.0  ;;  %v1203_v47 = vmax.f32 %v1166_v29, 0.0  ;;  %v1006_v17 = vpop.permute.xlu0 %1005  ;;  %v1011_v18 = vpop.permute.xlu1 %1010 }
 0x306   : > { %v1204_v40 = vmax.f32 %v1095_v32, 0.0  ;;  %v1206_v45 = vmax.f32 %v1168_v33, 0.0 }
 0x307   : > { %v1205_v48 = vmax.f32 %v1097_v36, 0.0  ;;  %v1207_v49 = vmax.f32 %v1170_v37, 0.0 }
 0x308   : > { %v1236_v52 = vpack.c.bf16 %v1204_v40, %v1200_v38  ;;  %v1238_v53 = vpack.c.bf16 %v1206_v45, %v1202_v39 }
 0x309   : > { %v1237_v54 = vpack.c.bf16 %v1205_v48, %v1201_v46  ;;  %v1239_v55 = vpack.c.bf16 %v1207_v49, %v1203_v47  ;;  %v1100_v56 = vpop.f32.mrb[36].mxu0  ;;  %v1173_v57 = vpop.f32.mrb[36].mxu1 }
 0x30a   : > { %v1101_v58 = vadd.f32 %v1100_v56, %v996_v50  ;;  %v1174_v59 = vadd.f32 %v1173_v57, %v996_v50  ;;  %v1102_v60 = vpop.f32.mrb[37].mxu0  ;;  %v1175_v61 = vpop.f32.mrb[37].mxu1  ;;  %v2013_v56 = vld [vmem:[%s2622_s2 + $0x28] sm:$0xff]   ;;  %v2014_v57 = vld [vmem:[%s2622_s2 + $0x30] sm:$0xff]  }
 0x30b   : > { %v1103_v62 = vadd.f32 %v1102_v60, %v996_v50  ;;  %v1176_v63 = vadd.f32 %v1175_v61, %v996_v50  ;;  %v1104_v1 = vpop.f32.mrb[38].mxu0  ;;  %v1177_v2 = vpop.f32.mrb[38].mxu1  ;;  %1330 = vmatprep.subr.bf16.mxu0 %v1237_v54  ;;  %1403 = vmatprep.subr.bf16.mxu1 %v1239_v55  ;;  %v2012_v55 = vld [vmem:[%s2622_s2 + $0x20] sm:$0xff]  }
 0x30c   : > { %v1105_v3 = vadd.f32 %v1104_v1, %v1001_v51  ;;  %v1178_v4 = vadd.f32 %v1177_v2, %v1001_v51  ;;  %v1106_v5 = vpop.f32.mrb[39].mxu0  ;;  %v1179_v6 = vpop.f32.mrb[39].mxu1  ;;  %1331 = vmatpush1.bf16.msra.mxu0 %v1236_v52  ;;  %1404 = vmatpush1.bf16.msra.mxu1 %v1238_v53  ;;  %v1208_v9 = vmax.f32 %v1101_v58, 0.0  ;;  %v1210_v10 = vmax.f32 %v1174_v59, 0.0  ;;  %v2015_v58 = vld [vmem:[%s2622_s2 + $0x38] sm:$0xff]  }
 0x30d   : > { %v1107_v7 = vadd.f32 %v1106_v5, %v1001_v51  ;;  %v1180_v8 = vadd.f32 %v1179_v6, %v1001_v51  ;;  %v1209_v13 = vmax.f32 %v1103_v62, 0.0  ;;  %v1211_v14 = vmax.f32 %v1176_v63, 0.0  ;;  %v1259_v59 = vpop.permute.xlu0 %1258  ;;  %v1264_v60 = vpop.permute.xlu1 %1263 }
 0x30e   : > { %v1212_v11 = vmax.f32 %v1105_v3, 0.0  ;;  %v1214_v12 = vmax.f32 %v1178_v4, 0.0 }
 0x30f   : > { %v1213_v15 = vmax.f32 %v1107_v7, 0.0  ;;  %v1215_v16 = vmax.f32 %v1180_v8, 0.0 }
 0x310   : > { %v1240_v19 = vpack.c.bf16 %v1212_v11, %v1208_v9  ;;  %v1242_v20 = vpack.c.bf16 %v1214_v12, %v1210_v10 }
 0x311   : > { %v1241_v21 = vpack.c.bf16 %v1213_v15, %v1209_v13  ;;  %v1243_v22 = vpack.c.bf16 %v1215_v16, %v1211_v14  ;;  %v1110_v23 = vpop.f32.mrb[40].mxu0  ;;  %v1183_v24 = vpop.f32.mrb[40].mxu1 }
 0x312   : > { %v1111_v25 = vadd.f32 %v1110_v23, %v1006_v17  ;;  %v1184_v26 = vadd.f32 %v1183_v24, %v1006_v17  ;;  %v1112_v27 = vpop.f32.mrb[41].mxu0  ;;  %v1185_v28 = vpop.f32.mrb[41].mxu1 }
 0x313   : > { %v1113_v29 = vadd.f32 %v1112_v27, %v1006_v17  ;;  %v1186_v30 = vadd.f32 %v1185_v28, %v1006_v17  ;;  %v1114_v31 = vpop.f32.mrb[42].mxu0  ;;  %v1187_v32 = vpop.f32.mrb[42].mxu1  ;;  %1332 = vmatprep.subr.bf16.mxu0 %v1241_v21  ;;  %1405 = vmatprep.subr.bf16.mxu1 %v1243_v22 }
 0x314   : > { %v1115_v33 = vadd.f32 %v1114_v31, %v1011_v18  ;;  %v1188_v34 = vadd.f32 %v1187_v32, %v1011_v18  ;;  %v1116_v35 = vpop.f32.mrb[43].mxu0  ;;  %v1189_v36 = vpop.f32.mrb[43].mxu1  ;;  %1333 = vmatpush1.bf16.msra.mxu0 %v1240_v19  ;;  %1406 = vmatpush1.bf16.msra.mxu1 %v1242_v20  ;;  %v1216_v39 = vmax.f32 %v1111_v25, 0.0  ;;  %v1218_v40 = vmax.f32 %v1184_v26, 0.0 }
 0x315   : > { %v1117_v37 = vadd.f32 %v1116_v35, %v1011_v18  ;;  %v1190_v38 = vadd.f32 %v1189_v36, %v1011_v18  ;;  %v1217_v47 = vmax.f32 %v1113_v29, 0.0  ;;  %v1219_v48 = vmax.f32 %v1186_v30, 0.0  ;;  %v1269_v21 = vpop.permute.xlu0 %1268  ;;  %v1274_v22 = vpop.permute.xlu1 %1273 }
 0x316   : > { %v1220_v45 = vmax.f32 %v1115_v33, 0.0  ;;  %v1222_v46 = vmax.f32 %v1188_v34, 0.0 }
 0x317   : > { %v1221_v49 = vmax.f32 %v1117_v37, 0.0  ;;  %v1223_v50 = vmax.f32 %v1190_v38, 0.0 }
 0x318   : > { %v1244_v51 = vpack.c.bf16 %v1220_v45, %v1216_v39  ;;  %v1246_v52 = vpack.c.bf16 %v1222_v46, %v1218_v40 }
 0x319   : > { %v1245_v53 = vpack.c.bf16 %v1221_v49, %v1217_v47  ;;  %v1247_v54 = vpack.c.bf16 %v1223_v50, %v1219_v48 }
 0x31b   : > { %1334 = vmatprep.subr.bf16.mxu0 %v1245_v53  ;;  %1407 = vmatprep.subr.bf16.mxu1 %v1247_v54 }
 0x31c   : > { %1335 = vmatpush1.bf16.msra.mxu0 %v1244_v51  ;;  %1408 = vmatpush1.bf16.msra.mxu1 %v1246_v52 }
 0x31f   : > { %1880 = vmatmul.mubr.msk.bf16.vlgmr.msra.gmra.mrb[44].mxu0 %vm1033_vm1, %v2012_v55  ;;  %1884 = vmatmul.mubr.msk.bf16.vlgmr.msra.gmra.mrb[44].mxu1 %vm1033_vm1, %v2012_v55  ;;  %v1279_v55 = vpop.permute.xlu0 %1278 }
 0x320   : > { %1370 = vmatprep.mubr.bf16.mxu0 %v2150_v0  ;;  %1443 = vmatprep.mubr.bf16.mxu1 %v2150_v0 }
 0x327   : > { %1881 = vmatmul.mubr.msk.bf16.gmra.mrb[48].mxu0 %vm1033_vm1, %v2013_v56  ;;  %1885 = vmatmul.mubr.msk.bf16.gmra.mrb[48].mxu1 %vm1033_vm1, %v2013_v56  ;;  %v1284_v56 = vpop.permute.xlu1 %1283 }
 0x328   : > { %1380 = vmatprep.mubr.bf16.mxu0 %v2150_v0  ;;  %1453 = vmatprep.mubr.bf16.mxu1 %v2150_v0 }
 0x32f   : > { %1882 = vmatmul.mubr.msk.bf16.gmra.mrb[52].mxu0 %vm1033_vm1, %v2014_v57  ;;  %1886 = vmatmul.mubr.msk.bf16.gmra.mrb[52].mxu1 %vm1033_vm1, %v2014_v57 }
 0x330   : > { %1390 = vmatprep.mubr.bf16.mxu0 %v2150_v0  ;;  %1463 = vmatprep.mubr.bf16.mxu1 %v2150_v0 }
 0x337   : > { %1883 = vmatmul.mubr.msk.bf16.gmra.mrb[56].mxu0 %vm1033_vm1, %v2015_v58  ;;  %1887 = vmatmul.mubr.msk.bf16.gmra.mrb[56].mxu1 %vm1033_vm1, %v2015_v58 }
 0x338   : > { %1558 = vmatprep.mubr.bf16.mxu0 %v2150_v0  ;;  %1599 = vmatprep.mubr.bf16.mxu1 %v2150_v0 }
 0x3f2   : > { %v1362_v61 = vpop.f32.mrb[44].mxu0  ;;  %v1435_v62 = vpop.f32.mrb[44].mxu1 }
 0x3f3   : > { %v1363_v63 = vadd.f32 %v1362_v61, %v1259_v59  ;;  %v1436_v1 = vadd.f32 %v1435_v62, %v1259_v59  ;;  %v1364_v2 = vpop.f32.mrb[45].mxu0  ;;  %v1437_v3 = vpop.f32.mrb[45].mxu1 }
 0x3f4   : > { %v1365_v4 = vadd.f32 %v1364_v2, %v1259_v59  ;;  %v1438_v5 = vadd.f32 %v1437_v3, %v1259_v59  ;;  %v1366_v6 = vpop.f32.mrb[46].mxu0  ;;  %v1439_v7 = vpop.f32.mrb[46].mxu1 }
 0x3f5   : > { %v1367_v8 = vadd.f32 %v1366_v6, %v1264_v60  ;;  %v1440_v9 = vadd.f32 %v1439_v7, %v1264_v60  ;;  %v1368_v10 = vpop.f32.mrb[47].mxu0  ;;  %v1441_v11 = vpop.f32.mrb[47].mxu1  ;;  %v1474_v14 = vmax.f32 %v1363_v63, 0.0  ;;  %v1476_v0 = vmax.f32 %v1436_v1, 0.0 }
 0x3f6   : > { %v1369_v12 = vadd.f32 %v1368_v10, %v1264_v60  ;;  %v1442_v13 = vadd.f32 %v1441_v11, %v1264_v60  ;;  %v1475_v17 = vmax.f32 %v1365_v4, 0.0  ;;  %v1477_v18 = vmax.f32 %v1438_v5, 0.0 }
 0x3f7   : > { %v1478_v15 = vmax.f32 %v1367_v8, 0.0  ;;  %v1480_v16 = vmax.f32 %v1440_v9, 0.0 }
 0x3f8   : > { %v1479_v19 = vmax.f32 %v1369_v12, 0.0  ;;  %v1481_v20 = vmax.f32 %v1442_v13, 0.0 }
 0x3f9   : > { %v1507_v23 = vpack.c.bf16 %v1478_v15, %v1474_v14  ;;  %v1509_v24 = vpack.c.bf16 %v1480_v16, %v1476_v0 }
 0x3fa   : > { %v1508_v25 = vpack.c.bf16 %v1479_v19, %v1475_v17  ;;  %v1510_v26 = vpack.c.bf16 %v1481_v20, %v1477_v18  ;;  %v1372_v27 = vpop.f32.mrb[48].mxu0  ;;  %v1445_v28 = vpop.f32.mrb[48].mxu1 }
 0x3fb   : > { %v1373_v29 = vadd.f32 %v1372_v27, %v1269_v21  ;;  %v1446_v30 = vadd.f32 %v1445_v28, %v1269_v21  ;;  %v1374_v31 = vpop.f32.mrb[49].mxu0  ;;  %v1447_v32 = vpop.f32.mrb[49].mxu1 }
 0x3fc   : > { %v1375_v33 = vadd.f32 %v1374_v31, %v1269_v21  ;;  %v1448_v34 = vadd.f32 %v1447_v32, %v1269_v21  ;;  %v1376_v35 = vpop.f32.mrb[50].mxu0  ;;  %v1449_v36 = vpop.f32.mrb[50].mxu1  ;;  %1526 = vmatprep.subr.bf16.mxu0 %v1508_v25  ;;  %1567 = vmatprep.subr.bf16.mxu1 %v1510_v26 }
 0x3fd   : > { %v1377_v37 = vadd.f32 %v1376_v35, %v1274_v22  ;;  %v1450_v38 = vadd.f32 %v1449_v36, %v1274_v22  ;;  %v1378_v39 = vpop.f32.mrb[51].mxu0  ;;  %v1451_v40 = vpop.f32.mrb[51].mxu1  ;;  %1527 = vmatpush1.bf16.msra.mxu0 %v1507_v23  ;;  %1568 = vmatpush1.bf16.msra.mxu1 %v1509_v24  ;;  %v1482_v47 = vmax.f32 %v1373_v29, 0.0  ;;  %v1484_v48 = vmax.f32 %v1446_v30, 0.0 }
 0x3fe   : > { %v1379_v45 = vadd.f32 %v1378_v39, %v1274_v22  ;;  %v1452_v46 = vadd.f32 %v1451_v40, %v1274_v22  ;;  %v1483_v51 = vmax.f32 %v1375_v33, 0.0  ;;  %v1485_v52 = vmax.f32 %v1448_v34, 0.0  ;;  %v1289_v21 = vpop.permute.xlu0 %1288  ;;  %v1294_v22 = vpop.permute.xlu1 %1293 }
 0x3ff   : > { %v1486_v49 = vmax.f32 %v1377_v37, 0.0  ;;  %v1488_v50 = vmax.f32 %v1450_v38, 0.0 }
 0x400   : > { %v1487_v53 = vmax.f32 %v1379_v45, 0.0  ;;  %v1489_v54 = vmax.f32 %v1452_v46, 0.0 }
 0x401   : > { %v1511_v57 = vpack.c.bf16 %v1486_v49, %v1482_v47  ;;  %v1513_v58 = vpack.c.bf16 %v1488_v50, %v1484_v48 }
 0x402   : > { %v1512_v59 = vpack.c.bf16 %v1487_v53, %v1483_v51  ;;  %v1514_v60 = vpack.c.bf16 %v1489_v54, %v1485_v52  ;;  %v1382_v61 = vpop.f32.mrb[52].mxu0  ;;  %v1455_v62 = vpop.f32.mrb[52].mxu1 }
 0x403   : > { %v1383_v63 = vadd.f32 %v1382_v61, %v1279_v55  ;;  %v1456_v1 = vadd.f32 %v1455_v62, %v1279_v55  ;;  %v1384_v2 = vpop.f32.mrb[53].mxu0  ;;  %v1457_v3 = vpop.f32.mrb[53].mxu1 }
 0x404   : > { %v1385_v4 = vadd.f32 %v1384_v2, %v1279_v55  ;;  %v1458_v5 = vadd.f32 %v1457_v3, %v1279_v55  ;;  %v1386_v6 = vpop.f32.mrb[54].mxu0  ;;  %v1459_v7 = vpop.f32.mrb[54].mxu1  ;;  %1528 = vmatprep.subr.bf16.mxu0 %v1512_v59  ;;  %1569 = vmatprep.subr.bf16.mxu1 %v1514_v60  ;;  %v1506_v59 = vld [vmem:[%s2622_s2 + $0x40] sm:$0xf] }
 0x405   : > { %v1387_v8 = vadd.f32 %v1386_v6, %v1284_v56  ;;  %v1460_v9 = vadd.f32 %v1459_v7, %v1284_v56  ;;  %v1388_v10 = vpop.f32.mrb[55].mxu0  ;;  %v1461_v11 = vpop.f32.mrb[55].mxu1  ;;  %1529 = vmatpush1.bf16.msra.mxu0 %v1511_v57  ;;  %1570 = vmatpush1.bf16.msra.mxu1 %v1513_v58  ;;  %v1490_v14 = vmax.f32 %v1383_v63, 0.0  ;;  %v1492_v0 = vmax.f32 %v1456_v1, 0.0 }
 0x406   : > { %v1389_v12 = vadd.f32 %v1388_v10, %v1284_v56  ;;  %v1462_v13 = vadd.f32 %v1461_v11, %v1284_v56  ;;  %v1491_v17 = vmax.f32 %v1385_v4, 0.0  ;;  %v1493_v18 = vmax.f32 %v1458_v5, 0.0  ;;  %v935_v60 = vpop.permute.xlu0 %934 }
 0x407   : > { %v1494_v15 = vmax.f32 %v1387_v8, 0.0  ;;  %v1496_v16 = vmax.f32 %v1460_v9, 0.0  ;;  %v937_v61 = vadd.f32 %v935_v60, %v2461_v41  ;;  %v939_v62 = vadd.f32 %v935_v60, %v2463_v42 }
 0x408   : > { %v1495_v19 = vmax.f32 %v1389_v12, 0.0  ;;  %v1497_v20 = vmax.f32 %v1462_v13, 0.0  ;;  %v938_v63 = vadd.f32 %v935_v60, %v2465_v43  ;;  %v940_v1 = vadd.f32 %v935_v60, %v2467_v44 }
 0x409   : > { %v1515_v23 = vpack.c.bf16 %v1494_v15, %v1490_v14  ;;  %v1517_v24 = vpack.c.bf16 %v1496_v16, %v1492_v0  ;;  %v2534_v2 = vadd.f32 -1.0, %v937_v61  ;;  %v2536_v3 = vadd.f32 -1.0, %v939_v62  ;;  %v1612_v14 = vpop.permute.xlu1 %1611 }
 0x40a   : > { %v1516_v25 = vpack.c.bf16 %v1495_v19, %v1491_v17  ;;  %v1518_v26 = vpack.c.bf16 %v1497_v20, %v1493_v18  ;;  %v1392_v27 = vpop.f32.mrb[56].mxu0  ;;  %v1465_v28 = vpop.f32.mrb[56].mxu1  ;;  %v2538_v4 = vadd.f32 -1.0, %v938_v63  ;;  %v2540_v5 = vadd.f32 -1.0, %v940_v1 }
 0x40b   : > { %v1393_v29 = vadd.f32 %v1392_v27, %v1289_v21  ;;  %v1466_v30 = vadd.f32 %v1465_v28, %v1289_v21  ;;  %v1394_v31 = vpop.f32.mrb[57].mxu0  ;;  %v1467_v32 = vpop.f32.mrb[57].mxu1  ;;  %v1626_v6 = vand.u32 2147483647, %v2534_v2  ;;  %v1628_v7 = vand.u32 2147483647, %v2536_v3 }
 0x40c   : > { %v1395_v33 = vadd.f32 %v1394_v31, %v1289_v21  ;;  %v1468_v34 = vadd.f32 %v1467_v32, %v1289_v21  ;;  %v1396_v35 = vpop.f32.mrb[58].mxu0  ;;  %v1469_v36 = vpop.f32.mrb[58].mxu1  ;;  %1530 = vmatprep.subr.bf16.mxu0 %v1516_v25  ;;  %1571 = vmatprep.subr.bf16.mxu1 %v1518_v26  ;;  %v1627_v41 = vand.u32 2147483647, %v2538_v4  ;;  %v1629_v42 = vand.u32 2147483647, %v2540_v5 }
 0x40d   : > { %v1397_v37 = vadd.f32 %v1396_v35, %v1294_v22  ;;  %v1470_v38 = vadd.f32 %v1469_v36, %v1294_v22  ;;  %v1398_v39 = vpop.f32.mrb[59].mxu0  ;;  %v1471_v40 = vpop.f32.mrb[59].mxu1  ;;  %1531 = vmatpush1.bf16.msra.mxu0 %v1515_v23  ;;  %1572 = vmatpush1.bf16.msra.mxu1 %v1517_v24  ;;  %v1498_v47 = vmax.f32 %v1393_v29, 0.0  ;;  %v1500_v48 = vmax.f32 %v1466_v30, 0.0 }
 0x40e   : > { %v1399_v45 = vadd.f32 %v1398_v39, %v1294_v22  ;;  %v1472_v46 = vadd.f32 %v1471_v40, %v1294_v22  ;;  %v1499_v51 = vmax.f32 %v1395_v33, 0.0  ;;  %v1501_v52 = vmax.f32 %v1468_v34, 0.0 }
 0x40f   : > { %v1502_v49 = vmax.f32 %v1397_v37, 0.0  ;;  %v1504_v50 = vmax.f32 %v1470_v38, 0.0  ;;  %v1630_v8 = vsub.f32 0.0, %v1626_v6  ;;  %v1632_v43 = vsub.f32 0.0, %v1628_v7 }
 0x410   : > { %v1503_v53 = vmax.f32 %v1399_v45, 0.0  ;;  %v1505_v54 = vmax.f32 %v1472_v46, 0.0  ;;  %v1631_v9 = vsub.f32 0.0, %v1627_v41  ;;  %v1633_v44 = vsub.f32 0.0, %v1629_v42 }
 0x411   : > { %v1519_v55 = vpack.c.bf16 %v1502_v49, %v1498_v47  ;;  %v1521_v56 = vpack.c.bf16 %v1504_v50, %v1500_v48  ;;  %v1634_v10 = vmul.f32 1.442695, %v1630_v8  ;;  %v1638_v11 = vmul.f32 1.442695, %v1632_v43 }
 0x412   : > { %v1520_v57 = vpack.c.bf16 %v1503_v53, %v1499_v51  ;;  %v1522_v58 = vpack.c.bf16 %v1505_v54, %v1501_v52  ;;  %v1636_v12 = vmul.f32 1.442695, %v1631_v9  ;;  %v1640_v13 = vmul.f32 1.442695, %v1633_v44 }
 0x413   : > { %2016 = vpow2.f32 %v1634_v10 }
 0x414   : > { %1532 = vmatprep.subr.bf16.mxu0 %v1520_v57  ;;  %1573 = vmatprep.subr.bf16.mxu1 %v1522_v58  ;;  %2018 = vpow2.f32 %v1638_v11 }
 0x415   : > { %1533 = vmatpush1.bf16.msra.mxu0 %v1519_v55  ;;  %1574 = vmatpush1.bf16.msra.mxu1 %v1521_v56  ;;  %2020 = vpow2.f32 %v1636_v12 }
 0x416   : > { %2022 = vpow2.f32 %v1640_v13 }
 0x418   : > { %1888 = vmatmul.mubr.msk.bf16.vlgmr.msra.gmra.mrb[60].mxu0 %vm1033_vm1, %v1506_v59  ;;  %1889 = vmatmul.mubr.msk.bf16.vlgmr.msra.gmra.mrb[60].mxu1 %vm1033_vm1, %v1506_v59 }
 0x41d   : > { %v2017_v28 = vpop.eup %2016 }
 0x41e   : > { %v2019_v31 = vpop.eup %2018  ;;  %v1642_v38 = vadd.f32 1.0, %v2017_v28  ;;  %v1645_v48 = vmul.f32 -0.5, %v2017_v28  ;;  %v1648_v62 = vand.u32 2147483647, %v2017_v28 }
 0x41f   : > { %v2021_v34 = vpop.eup %2020  ;;  %v1660_v39 = vadd.f32 1.0, %v2019_v31  ;;  %v1663_v51 = vmul.f32 -0.5, %v2019_v31  ;;  %v1666_v7 = vand.u32 2147483647, %v2019_v31 }
 0x420   : > { %v2023_v37 = vpop.eup %2022  ;;  %v1651_v40 = vadd.f32 1.0, %v2021_v34  ;;  %v1654_v54 = vmul.f32 -0.5, %v2021_v34  ;;  %v1646_v60 = vadd.f32 1.0, %v1645_v48  ;;  %v1657_v8 = vand.u32 2147483647, %v2021_v34 }
 0x421   : > { %v1669_v45 = vadd.f32 1.0, %v2023_v37  ;;  %v1672_v57 = vmul.f32 -0.5, %v2023_v37  ;;  %v1664_v63 = vadd.f32 1.0, %v1663_v51  ;;  %v1675_v10 = vand.u32 2147483647, %v2023_v37 }
 0x422   : > { %v1655_v41 = vadd.f32 1.0, %v1654_v54  ;;  %v1647_v9 = vmul.f32 %v2017_v28, %v1646_v60  ;;  %vm2546_vm2 = vcmp.lt.f32.partialorder %v1648_v62, 0.0004427343  ;;  %vm2552_vm3 = vcmp.lt.f32.partialorder %v1666_v7, 0.0004427343 }
 0x423   : > { %v1673_v43 = vadd.f32 1.0, %v1672_v57  ;;  %v1665_v12 = vmul.f32 %v2019_v31, %v1664_v63  ;;  %vm2560_vm4 = vcmp.lt.f32.partialorder %v1657_v8, 0.0004427343  ;;  %vm1676_vm5 = vcmp.lt.f32.partialorder %v1675_v10, 0.0004427343 }
 0x4eb   : > { %v1560_v0 = vpop.f32.mrb[60].mxu0  ;;  %v1601_v15 = vpop.f32.mrb[60].mxu1 }
 0x4ec   : > { %v1614_v16 = vadd.f32 %v1612_v14, %v1560_v0  ;;  %v1616_v17 = vadd.f32 %v1612_v14, %v1601_v15  ;;  %v1562_v18 = vpop.f32.mrb[61].mxu0  ;;  %v1603_v19 = vpop.f32.mrb[61].mxu1  ;;  %v1656_v15 = vmul.f32 %v2021_v34, %v1655_v41 }
 0x4ed   : > { %v1615_v20 = vadd.f32 %v1612_v14, %v1562_v18  ;;  %v1617_v21 = vadd.f32 %v1612_v14, %v1603_v19  ;;  %v1564_v22 = vpop.f32.mrb[62].mxu0  ;;  %v1605_v23 = vpop.f32.mrb[62].mxu1  ;;  %v1674_v19 = vmul.f32 %v2023_v37, %v1673_v43 }
 0x4ee   : > { %v1682_v24 = vsub.f32 0.0, %v1614_v16  ;;  %v1684_v25 = vsub.f32 0.0, %v1616_v17  ;;  %v1565_v26 = vpop.f32.mrb[63].mxu0  ;;  %v1606_v27 = vpop.f32.mrb[63].mxu1  ;;  %v1622_v16 = vmax.f32 %v2534_v2, 0.0  ;;  %v1623_v2 = vmax.f32 %v2538_v4, 0.0 }
 0x4ef   : > { %v1683_v29 = vsub.f32 0.0, %v1615_v20  ;;  %v1685_v30 = vsub.f32 0.0, %v1617_v21  ;;  %v1624_v21 = vmax.f32 %v2536_v3, 0.0 }
 0x4f0   : > { %v1686_v32 = vmul.f32 1.442695, %v1682_v24  ;;  %v1690_v33 = vmul.f32 1.442695, %v1684_v25 }
 0x4f1   : > { %v1688_v35 = vmul.f32 1.442695, %v1683_v29  ;;  %v1692_v36 = vmul.f32 1.442695, %v1685_v30  ;;  %v1625_v29 = vmax.f32 %v2540_v5, 0.0 }
 0x4f2   : > { %2024 = vpow2.f32 %v1686_v32 }
 0x4f3   : > { %2026 = vpow2.f32 %v1690_v33 }
 0x4f4   : > { %2028 = vpow2.f32 %v1688_v35 }
 0x4f5   : > { %2030 = vpow2.f32 %v1692_v36 }
 0x4f6   : > { %2032 = vlog2.f32 %v1642_v38 }
 0x4f7   : > { %2034 = vlog2.f32 %v1660_v39 }
 0x4f8   : > { %2036 = vlog2.f32 %v1651_v40 }
 0x4f9   : > { %2038 = vlog2.f32 %v1669_v45 }
 0x4fc   : > { %v2025_v46 = vpop.eup %2024 }
 0x4fd   : > { %v2027_v47 = vpop.eup %2026  ;;  %v1694_v49 = vadd.f32 1.0, %v2025_v46 }
 0x4fe   : > { %v2029_v50 = vpop.eup %2028  ;;  %v1696_v52 = vadd.f32 1.0, %v2027_v47 }
 0x4ff   : > { %v2031_v53 = vpop.eup %2030  ;;  %2040 = vrcp.f32 %v1694_v49  ;;  %v1695_v55 = vadd.f32 1.0, %v2029_v50 }
 0x500   : > { %v2033_v56 = vpop.eup %2032  ;;  %2042 = vrcp.f32 %v1696_v52  ;;  %v1697_v58 = vadd.f32 1.0, %v2031_v53 }
 0x501   : > { %v2035_v59 = vpop.eup %2034  ;;  %2044 = vrcp.f32 %v1695_v55  ;;  %v1644_v6 = vmul.f32 0.6931472, %v2033_v56 }
 0x502   : > { %v2037_v61 = vpop.eup %2036  ;;  %2046 = vrcp.f32 %v1697_v58  ;;  %v1662_v42 = vmul.f32 0.6931472, %v2035_v59 }
 0x503   : > { %v2039_v1 = vpop.eup %2038  ;;  %v1653_v44 = vmul.f32 0.6931472, %v2037_v61  ;;  %v1650_v14 = vsel %vm2546_vm2, %v1647_v9, %v1644_v6 }
 0x504   : > { %v1671_v13 = vmul.f32 0.6931472, %v2039_v1  ;;  %v1668_v17 = vsel %vm2552_vm3, %v1665_v12, %v1662_v42  ;;  %v1678_v24 = vadd.f32 %v1650_v14, %v1622_v16 }
 0x505   : > { %v1659_v22 = vsel %vm2560_vm4, %v1656_v15, %v1653_v44  ;;  %v1680_v28 = vadd.f32 %v1668_v17, %v1624_v21 }
 0x506   : > { %v1677_v25 = vsel %vm1676_vm5, %v1674_v19, %v1671_v13  ;;  %v1679_v32 = vadd.f32 %v1659_v22, %v1623_v2 }
 0x507   : > { %v1681_v34 = vadd.f32 %v1677_v25, %v1625_v29 }
 0x509   : > { %v2041_v20 = vpop.eup %2040 }
 0x50a   : > { %v2043_v23 = vpop.eup %2042  ;;  %v1706_v26 = vrot.slane %v2041_v20, 7 }
 0x50b   : > { %v2045_v27 = vpop.eup %2044  ;;  %v1708_v30 = vrot.slane %v2043_v23, 7 }
 0x50c   : > { %v2047_v31 = vpop.eup %2046  ;;  %v1715_v3 = vsel %vm1714_vm6, %v1678_v24, %v1706_v26  ;;  %v1707_v33 = vrot.slane %v2045_v27, 7 }
 0x50d   : > { %v1717_v35 = vsel %vm1714_vm6, %v1680_v28, %v1708_v30  ;;  %v1709_v36 = vrot.slane %v2047_v31, 7 }
 0x50e   : > { %v1716_v4 = vsel %vm1714_vm6, %v1679_v32, %v1707_v33 }
 0x50f   : > { %v1718_v37 = vsel %vm1714_vm6, %v1681_v34, %v1709_v36  ;;  %v1723_v5 = vcombine.low %v1715_v3, %v1716_v4 }
 0x510   : > { %v1724_v38 = vcombine.low %v1717_v35, %v1718_v37 }
 0x511   : > { %1727 = vst [vmem:[%s215_s29] sm:$0xff] %v1723_v5 }
 0x512   : > { %1728 = vst [vmem:[%s215_s29 + $0x8] sm:$0xff] %v1724_v38 }
 0x513   : > { %2091 = shalt.err (!%p2088_p2)
}
 0x514   : > { %s2092_s14 = scalar_lea.hbm %s2577_s7, 256  ;;  %s2096_s8 = scalar_lea.hbm %s2624_s4, 2048 }
 0x515   : > { %p2093_p4 = scmp.ne.s32.totalorder %s2577_s7, %s2092_s14  ;;  %p2097_p13 = scmp.lt.u32.totalorder %s2577_s7, %s2624_s4 }
 0x516   : > { %p2098_p1 = scmp.lt.u32.totalorder %s2096_s8, %s2092_s14  ;;  %p2100_p6 = scmp.lt.u32.totalorder %s2092_s14, %s2577_s7 }
 0x517   : > { %p2094_p5 = pnand %p2093_p4, %p2638_p10 }
 0x518   : > { %p2099_p3 = por %p2098_p1, %p2097_p13 }
 0x519   : > { %p2095_p7 = pneg %p2094_p5 }
 0x51a   : > { %p2101_p11 = por %p2100_p6, %p2099_p3 }
 0x51c   : > { %p2102_p12 = pnand %p2101_p11, %p2095_p7 }
 0x51e   : > { %2105 = shalt.err (!%p2102_p12)
}
 0x51f   : > { %1935 = dma.vmem_to_hbm [thread:$0]  (%p2638_p10), %s2579_s30, 256, %s2577_s7, %s1730_s19  }
 0x520 PF: > { %p1946_p8 = scmp.ge.s32.totalorder %s2144_s18, 2  ;;  %s1756_s12 = sand.u32 1, %s2132_s15  }
 0x521   : > { %p2639_p9 = scmp.ne.s32.totalorder %s2629_s28, 0  ;;  %s1757_s25 = scalar_lea.sflag [#allocation4], %s1756_s12 }
 0x523   : > { %p1942_p0 = pnand %p1946_p8, %p2639_p9 }
 0x525   : > { %2127 = dma.done.wait (!%p1942_p0), %s1757_s25, 256  }
 0x526   : > { %2129 = vsyncadd (!%p1942_p0), %s1757_s25, 4294967040  ;;  %p17_p2 = scmp.ge.s32.totalorder %s2202_s21, 10   ;;  %s2640_s15 = smov %s2136_s16 }
 0x527   : > { %s2641_s16 = smov %s2140_s17  ;;  %s2642_s17 = smov %s2214_s24 }
 0x528   : > { %s2643_s18 = smov %s2202_s21  ;;  %19 = sbr.rel (!%p17_p2) target bundleno = 5 (0x5), region = 81 }
 0x52f   :  { %1762 = vsyncpa [#allocation3], 1 }
 0x530   :  { %1764 = vsyncpa [#allocation3 + $0x1], 1 }
 0x531   :  { %1765 = vsyncpa [#allocation4], 1 }
 0x532   :  { %1767 = vsyncpa [#allocation4 + $0x1], 1 }

</bundles_post_ra>
